<compile_context>
chip_gen: v7x
topology: tpu7x:2x2x1
jax: 0.10.0
libtpu: 0.0.40
codegen_flags: <defaults>
</compile_context>

<pallas_src>
import functools

import jax
import jax.numpy as jnp
from jax.experimental import pallas as pl
from jax.experimental.pallas import tpu as pltpu

C_PAD = 128     # lane-dense output-channel width carried through the whole network
BN_EPS = 1e-5


# ------------------------- Pallas kernels -------------------------

def _conv_bn_relu_maxpool(p_ref, w_ref, gamma_ref, beta_ref, mq):
    """3x3 conv (single MXU matmul over all 4 pool positions) + BN(batch stats) + ReLU + 2x2 maxpool.

    p_ref:  (4*mq, K) bf16  pool-position-major im2col patches; mq = N*(H/2)*(W/2),
                            K = 9*Cin_real rounded up to a multiple of 16.
    w_ref:  (K, 128)  bf16  conv weights, (kh,kw,cin)-major rows, Cout zero-padded to 128 lanes.
    gamma_ref, beta_ref: (1, 128) f32.
    Returns the pooled (mq, 128) f32 activation, rows ordered (n, h2, w2).
    """
    z = jnp.dot(p_ref[...], w_ref[...], preferred_element_type=jnp.float32)   # (4*mq, 128)
    # BatchNorm2d training-mode statistics over this branch's N*H*W pixels (= all 4*mq rows).
    # Two-pass variance for numerical robustness. Conv bias omitted: BN mean subtraction
    # cancels it exactly.
    inv_n = 1.0 / (4 * mq)
    mean = jnp.sum(z, axis=0, keepdims=True) * inv_n
    zc = z - mean
    var = jnp.sum(zc * zc, axis=0, keepdims=True) * inv_n
    scale = gamma_ref[...] * jax.lax.rsqrt(var + BN_EPS)
    a = jnp.maximum(zc * scale + beta_ref[...], 0.0)                          # BN affine + ReLU
    # 2x2 MaxPool == elementwise max across the four pool-position row blocks.
    return jnp.maximum(jnp.maximum(a[0:mq], a[mq:2 * mq]),
                       jnp.maximum(a[2 * mq:3 * mq], a[3 * mq:4 * mq]))


def conv_block_kernel(p_ref, w_ref, gamma_ref, beta_ref, o_ref):
    """Conv3x3 + BN + ReLU + MaxPool2; stores the pooled (mq, 128) activation (lane-dense bf16)."""
    pooled = _conv_bn_relu_maxpool(p_ref, w_ref, gamma_ref, beta_ref, o_ref.shape[0])
    o_ref[...] = pooled.astype(o_ref.dtype)


def conv3_head_kernel(p_ref, w_ref, gamma_ref, beta_ref,
                      w1_ref, b1_ref, w2_ref, b2_ref, o_ref, *, batch, spatial):
    """Last conv block + AdaptiveAvgPool(1,1) + Linear(128,128)+ReLU+Linear(128,1).

    AvgPool is an in-kernel reshape + mean over the h2*w2 pooled positions.
    w2_ref/b2_ref are zero-padded to 128 output lanes; the real logit is column 0.
    o_ref: (batch, 128) f32.
    """
    pooled = _conv_bn_relu_maxpool(p_ref, w_ref, gamma_ref, beta_ref, batch * spatial)
    feat = jnp.mean(pooled.reshape(batch, spatial, C_PAD), axis=1)            # (batch, 128)
    h = jnp.dot(feat, w1_ref[...], preferred_element_type=jnp.float32) + b1_ref[...]
    h = jnp.maximum(h, 0.0)
    o_ref[...] = jnp.dot(h, w2_ref[...], preferred_element_type=jnp.float32) + b2_ref[...]


# ------------------------- wrappers -------------------------

def _pool_major_patches(x, k_dim):
    """im2col for a 3x3/stride1/pad1 conv, rows grouped by 2x2-maxpool window position.

    x: (G, N, H, W, C) with H, W even and C the REAL channel count (no padding).
    returns (G, 4*N*(H//2)*(W//2), k_dim) bf16; within each branch rows are ordered
    (py, px, n, h2, w2) so the kernel can fuse the maxpool with simple row-block slices.
    """
    G, N, H, W, C = x.shape
    xp = jnp.pad(x, ((0, 0), (0, 0), (1, 1), (1, 1), (0, 0)))
    cols = jnp.concatenate(
        [xp[:, :, dh:dh + H, dw:dw + W, :] for dh in range(3) for dw in range(3)],
        axis=-1)                                                # (G, N, H, W, 9*C)
    cols = cols.reshape(G, N, H // 2, 2, W // 2, 2, 9 * C)
    cols = jnp.transpose(cols, (0, 3, 5, 1, 2, 4, 6))            # (G, py, px, N, H/2, W/2, 9C)
    cols = cols.reshape(G, 4 * N * (H // 2) * (W // 2), 9 * C)
    if k_dim > 9 * C:                                            # pad K only to a multiple of 16
        cols = jnp.pad(cols, ((0, 0), (0, 0), (0, k_dim - 9 * C)))
    return cols.astype(jnp.bfloat16)


def conv_block(x, wmat, gamma, beta):
    """(G,N,H,W,Cin) -> (G,N,H/2,W/2,128) bf16; one pallas_call, grid over the G branches."""
    G, N, H, W, _ = x.shape
    h2, w2 = H // 2, W // 2
    mq = N * h2 * w2
    k_dim = wmat.shape[0]
    patches = _pool_major_patches(x, k_dim)
    out = pl.pallas_call(
        conv_block_kernel,
        out_shape=jax.ShapeDtypeStruct((G, mq, C_PAD), jnp.bfloat16),
        grid=(G,),
        in_specs=[
            pl.BlockSpec((None, 4 * mq, k_dim), lambda b: (b, 0, 0)),
            pl.BlockSpec((k_dim, C_PAD), lambda b: (0, 0)),
            pl.BlockSpec((1, C_PAD), lambda b: (0, 0)),
            pl.BlockSpec((1, C_PAD), lambda b: (0, 0)),
        ],
        out_specs=pl.BlockSpec((None, mq, C_PAD), lambda b: (b, 0, 0)),
        compiler_params=pltpu.CompilerParams(dimension_semantics=("parallel",)),
    )(patches, wmat, gamma, beta)
    return out.reshape(G, N, h2, w2, C_PAD)


def conv3_head_block(x, wmat, gamma, beta, w1, b1, w2p, b2p):
    """Last conv block fused with avgpool + MLP head; returns (G, N, 128), logit in lane 0."""
    G, N, H, W, _ = x.shape
    h2, w2 = H // 2, W // 2
    mq = N * h2 * w2
    k_dim = wmat.shape[0]
    patches = _pool_major_patches(x, k_dim)
    kernel = functools.partial(conv3_head_kernel, batch=N, spatial=h2 * w2)
    out = pl.pallas_call(
        kernel,
        out_shape=jax.ShapeDtypeStruct((G, N, C_PAD), jnp.float32),
        grid=(G,),
        in_specs=[
            pl.BlockSpec((None, 4 * mq, k_dim), lambda b: (b, 0, 0)),
            pl.BlockSpec((k_dim, C_PAD), lambda b: (0, 0)),
            pl.BlockSpec((1, C_PAD), lambda b: (0, 0)),
            pl.BlockSpec((1, C_PAD), lambda b: (0, 0)),
            pl.BlockSpec((C_PAD, C_PAD), lambda b: (0, 0)),
            pl.BlockSpec((1, C_PAD), lambda b: (0, 0)),
            pl.BlockSpec((C_PAD, C_PAD), lambda b: (0, 0)),
            pl.BlockSpec((1, C_PAD), lambda b: (0, 0)),
        ],
        out_specs=pl.BlockSpec((None, N, C_PAD), lambda b: (b, 0, 0)),
        compiler_params=pltpu.CompilerParams(dimension_semantics=("parallel",)),
    )(patches, wmat, gamma, beta, w1, b1, w2p, b2p)
    return out


def siamese_forward(x1, x2, params):
    """Both branches in one batched pass (grid axis); BatchNorm statistics stay per-branch."""
    x = jnp.stack([x1, x2], axis=0)                             # (2, B, 1, H, W)
    x = jnp.transpose(x, (0, 1, 3, 4, 2)).astype(jnp.float32)    # NCHW -> NHWC (channels_last)
    a = conv_block(x, *params["conv1"])                          # (2, B, 8, 8, 128); 32 real ch
    a = conv_block(a[..., :32], *params["conv2"])                # (2, B, 4, 4, 128); 64 real ch
    out = conv3_head_block(a[..., :64], *params["conv3"], *params["fc"])   # (2, B, 128)
    return out[0, :, :1], out[1, :, :1]                          # real logit lives in lane 0


# ------------------------- deterministic parameter init -------------------------

def init_params(key):
    keys = jax.random.split(key, 5)

    def conv_params(k, cin, cout):
        # kaiming_normal_(mode='fan_out', nonlinearity='relu'): std = sqrt(2 / (cout*3*3))
        std = (2.0 / (cout * 9)) ** 0.5
        w = std * jax.random.normal(k, (3, 3, cin, cout), jnp.float32)        # HWIO
        k_dim = ((9 * cin + 15) // 16) * 16    # K padded only to a bf16-sublane-friendly multiple
        wmat = w.reshape(9 * cin, cout)
        wmat = jnp.pad(wmat, ((0, k_dim - 9 * cin), (0, C_PAD - cout))).astype(jnp.bfloat16)
        gamma = jnp.ones((1, C_PAD), jnp.float32)
        beta = jnp.zeros((1, C_PAD), jnp.float32)
        # conv bias intentionally omitted: BatchNorm's mean subtraction cancels it exactly.
        return wmat, gamma, beta

    conv1 = conv_params(keys[0], 1, 32)
    conv2 = conv_params(keys[1], 32, 64)
    conv3 = conv_params(keys[2], 64, 128)

    def linear_init(k, fin, fout):
        bound = 1.0 / fin ** 0.5
        w = jax.random.uniform(k, (fin, fout), jnp.float32, -bound, bound)
        b = jax.random.uniform(jax.random.fold_in(k, 1), (fout,),
                               jnp.float32, -bound, bound)
        return w, b

    w1, b1 = linear_init(keys[3], 128, 128)
    w2, b2 = linear_init(keys[4], 128, 1)
    w2p = jnp.pad(w2, ((0, 0), (0, C_PAD - 1)))    # lane-dense FC2: logit in column 0
    b2p = jnp.pad(b2, (0, C_PAD - 1))
    return {"conv1": conv1, "conv2": conv2, "conv3": conv3,
            "fc": (w1, b1.reshape(1, C_PAD), w2p, b2p.reshape(1, C_PAD))}


if __name__ == "__main__":
    key = jax.random.PRNGKey(0)
    pkey, k1, k2 = jax.random.split(key, 3)
    params = init_params(pkey)

    # Module's first conv expects 1 input channel; inputs are NCHW like PyTorch.
    x1 = jax.random.normal(k1, (2, 1, 16, 16), jnp.float32)
    x2 = jax.random.normal(k2, (2, 1, 16, 16), jnp.float32)

    fwd = jax.jit(lambda a, b: siamese_forward(a, b, params))
    o1, o2 = fwd(x1, x2)
    jax.block_until_ready((o1, o2))
    assert o1.shape == (2, 1) and o2.shape == (2, 1)
    assert o1.dtype == jnp.float32 and o2.dtype == jnp.float32
    print("KERNEL_OK")
</pallas_src>

<mosaic_0001>
module attributes {stable_mosaic.version = 11 : i64} {
  func.func @conv_block_kernel(%arg0: i32, %arg1: memref<1x512x16xbf16, #tpu.memory_space<vmem>>, %arg2: memref<16x128xbf16, #tpu.memory_space<vmem>>, %arg3: memref<1x128xf32, #tpu.memory_space<vmem>>, %arg4: memref<1x128xf32, #tpu.memory_space<vmem>>, %arg5: memref<1x128x128xbf16, #tpu.memory_space<vmem>>) attributes {dimension_semantics = [#tpu.dimension_semantics<parallel>], iteration_bounds = array<i64: 2>, scalar_prefetch = 0 : i64, scratch_operands = 0 : i64, tpu.core_type = #tpu.core_type<tc>, window_params = [{transform_indices = @transform_0, window_bounds = array<i64: 1, 512, 16>}, {pipeline_mode = #tpu.pipeline_mode<synchronous>, transform_indices = @transform_1, window_bounds = array<i64: 16, 128>}, {pipeline_mode = #tpu.pipeline_mode<synchronous>, transform_indices = @transform_2, window_bounds = array<i64: 1, 128>}, {pipeline_mode = #tpu.pipeline_mode<synchronous>, transform_indices = @transform_3, window_bounds = array<i64: 1, 128>}, {transform_indices = @transform_4, window_bounds = array<i64: 1, 128, 128>}]} {
    %c0 = arith.constant 0 : index
    %c0_0 = arith.constant 0 : index
    %c0_1 = arith.constant 0 : index
    %0 = vector.load %arg1[%c0, %c0_0, %c0_1] : memref<1x512x16xbf16, #tpu.memory_space<vmem>>, vector<1x512x16xbf16>
    %1 = vector.shape_cast %0 : vector<1x512x16xbf16> to vector<512x16xbf16>
    %c0_2 = arith.constant 0 : index
    %c0_3 = arith.constant 0 : index
    %2 = vector.load %arg2[%c0_2, %c0_3] : memref<16x128xbf16, #tpu.memory_space<vmem>>, vector<16x128xbf16>
    %cst = arith.constant dense<0.000000e+00> : vector<512x128xf32>
    %3 = tpu.matmul %1, %2, %cst {dimension_numbers = #tpu.dot_dimension_numbers<[1], [0], [0], [1], [0, 0, 1, 1], [], []>} : vector<512x16xbf16>, vector<16x128xbf16>, vector<512x128xf32> -> vector<512x128xf32>
    %cst_4 = arith.constant dense<0.000000e+00> : vector<128xf32>
    %4 = vector.multi_reduction <add>, %3, %cst_4 [0] : vector<512x128xf32> to vector<128xf32>
    %5 = vector.shape_cast %4 : vector<128xf32> to vector<1x128xf32>
    %cst_5 = arith.constant 0.001953125 : f32
    %6 = vector.broadcast %cst_5 : f32 to vector<1x128xf32>
    %7 = arith.mulf %5, %6 : vector<1x128xf32>
    %8 = vector.broadcast %7 : vector<1x128xf32> to vector<512x128xf32>
    %9 = arith.subf %3, %8 : vector<512x128xf32>
    %10 = arith.mulf %9, %9 : vector<512x128xf32>
    %cst_6 = arith.constant dense<0.000000e+00> : vector<128xf32>
    %11 = vector.multi_reduction <add>, %10, %cst_6 [0] : vector<512x128xf32> to vector<128xf32>
    %12 = vector.shape_cast %11 : vector<128xf32> to vector<1x128xf32>
    %cst_7 = arith.constant 0.001953125 : f32
    %13 = vector.broadcast %cst_7 : f32 to vector<1x128xf32>
    %14 = arith.mulf %12, %13 : vector<1x128xf32>
    %c0_8 = arith.constant 0 : index
    %c0_9 = arith.constant 0 : index
    %15 = vector.load %arg3[%c0_8, %c0_9] : memref<1x128xf32, #tpu.memory_space<vmem>>, vector<1x128xf32>
    %cst_10 = arith.constant 9.99999974E-6 : f32
    %16 = vector.broadcast %cst_10 : f32 to vector<1x128xf32>
    %17 = arith.addf %14, %16 : vector<1x128xf32>
    %18 = math.rsqrt %17 : vector<1x128xf32>
    %19 = arith.mulf %15, %18 : vector<1x128xf32>
    %20 = vector.broadcast %19 : vector<1x128xf32> to vector<512x128xf32>
    %21 = arith.mulf %9, %20 : vector<512x128xf32>
    %c0_11 = arith.constant 0 : index
    %c0_12 = arith.constant 0 : index
    %22 = vector.load %arg4[%c0_11, %c0_12] : memref<1x128xf32, #tpu.memory_space<vmem>>, vector<1x128xf32>
    %23 = vector.broadcast %22 : vector<1x128xf32> to vector<512x128xf32>
    %24 = arith.addf %21, %23 : vector<512x128xf32>
    %cst_13 = arith.constant 0.000000e+00 : f32
    %25 = vector.broadcast %cst_13 : f32 to vector<512x128xf32>
    %26 = arith.maximumf %24, %25 : vector<512x128xf32>
    %27 = vector.extract_strided_slice %26 {offsets = [0, 0], sizes = [128, 128], strides = [1, 1]} : vector<512x128xf32> to vector<128x128xf32>
    %28 = vector.extract_strided_slice %26 {offsets = [128, 0], sizes = [128, 128], strides = [1, 1]} : vector<512x128xf32> to vector<128x128xf32>
    %29 = arith.maximumf %27, %28 : vector<128x128xf32>
    %30 = vector.extract_strided_slice %26 {offsets = [256, 0], sizes = [128, 128], strides = [1, 1]} : vector<512x128xf32> to vector<128x128xf32>
    %31 = vector.extract_strided_slice %26 {offsets = [384, 0], sizes = [128, 128], strides = [1, 1]} : vector<512x128xf32> to vector<128x128xf32>
    %32 = arith.maximumf %30, %31 : vector<128x128xf32>
    %33 = arith.maximumf %29, %32 : vector<128x128xf32>
    %34 = arith.truncf %33 : vector<128x128xf32> to vector<128x128xbf16>
    %c0_14 = arith.constant 0 : index
    %c0_15 = arith.constant 0 : index
    %c0_16 = arith.constant 0 : index
    %35 = vector.load %arg5[%c0_14, %c0_15, %c0_16] : memref<1x128x128xbf16, #tpu.memory_space<vmem>>, vector<1x128x128xbf16>
    %36 = vector.shape_cast %35 : vector<1x128x128xbf16> to vector<128x128xbf16>
    %37 = vector.shape_cast %34 : vector<128x128xbf16> to vector<1x128x128xbf16>
    tpu.vector_store %arg5[%c0_14, %c0_15, %c0_16], %37 {strides = array<i32>} : memref<1x128x128xbf16, #tpu.memory_space<vmem>>, vector<1x128x128xbf16>,
    return
  }
  func.func @transform_0(%arg0: i32) -> (i32, i32, i32) {
    %c0_i32 = arith.constant 0 : i32
    %c0_i32_0 = arith.constant 0 : i32
    %c0_i32_1 = arith.constant 0 : i32
    return %arg0, %c0_i32, %c0_i32_0 : i32, i32, i32
  }
  func.func @transform_1(%arg0: i32) -> (i32, i32) {
    %c0_i32 = arith.constant 0 : i32
    %c0_i32_0 = arith.constant 0 : i32
    %c0_i32_1 = arith.constant 0 : i32
    return %c0_i32, %c0_i32_0 : i32, i32
  }
  func.func @transform_2(%arg0: i32) -> (i32, i32) {
    %c0_i32 = arith.constant 0 : i32
    %c0_i32_0 = arith.constant 0 : i32
    %c0_i32_1 = arith.constant 0 : i32
    return %c0_i32, %c0_i32_0 : i32, i32
  }
  func.func @transform_3(%arg0: i32) -> (i32, i32) {
    %c0_i32 = arith.constant 0 : i32
    %c0_i32_0 = arith.constant 0 : i32
    %c0_i32_1 = arith.constant 0 : i32
    return %c0_i32, %c0_i32_0 : i32, i32
  }
  func.func @transform_4(%arg0: i32) -> (i32, i32, i32) {
    %c0_i32 = arith.constant 0 : i32
    %c0_i32_0 = arith.constant 0 : i32
    %c0_i32_1 = arith.constant 0 : i32
    return %arg0, %c0_i32, %c0_i32_0 : i32, i32, i32
  }
}

module attributes {stable_mosaic.version = 11 : i64} {
  func.func @conv_block_kernel(%arg0: i32, %arg1: memref<1x128x288xbf16, #tpu.memory_space<vmem>>, %arg2: memref<288x128xbf16, #tpu.memory_space<vmem>>, %arg3: memref<1x128xf32, #tpu.memory_space<vmem>>, %arg4: memref<1x128xf32, #tpu.memory_space<vmem>>, %arg5: memref<1x32x128xbf16, #tpu.memory_space<vmem>>) attributes {dimension_semantics = [#tpu.dimension_semantics<parallel>], iteration_bounds = array<i64: 2>, scalar_prefetch = 0 : i64, scratch_operands = 0 : i64, tpu.core_type = #tpu.core_type<tc>, window_params = [{transform_indices = @transform_0, window_bounds = array<i64: 1, 128, 288>}, {pipeline_mode = #tpu.pipeline_mode<synchronous>, transform_indices = @transform_1, window_bounds = array<i64: 288, 128>}, {pipeline_mode = #tpu.pipeline_mode<synchronous>, transform_indices = @transform_2, window_bounds = array<i64: 1, 128>}, {pipeline_mode = #tpu.pipeline_mode<synchronous>, transform_indices = @transform_3, window_bounds = array<i64: 1, 128>}, {transform_indices = @transform_4, window_bounds = array<i64: 1, 32, 128>}]} {
    %c0 = arith.constant 0 : index
    %c0_0 = arith.constant 0 : index
    %c0_1 = arith.constant 0 : index
    %0 = vector.load %arg1[%c0, %c0_0, %c0_1] : memref<1x128x288xbf16, #tpu.memory_space<vmem>>, vector<1x128x288xbf16>
    %1 = vector.shape_cast %0 : vector<1x128x288xbf16> to vector<128x288xbf16>
    %c0_2 = arith.constant 0 : index
    %c0_3 = arith.constant 0 : index
    %2 = vector.load %arg2[%c0_2, %c0_3] : memref<288x128xbf16, #tpu.memory_space<vmem>>, vector<288x128xbf16>
    %cst = arith.constant dense<0.000000e+00> : vector<128x128xf32>
    %3 = tpu.matmul %1, %2, %cst {dimension_numbers = #tpu.dot_dimension_numbers<[1], [0], [0], [1], [0, 0, 1, 1], [], []>} : vector<128x288xbf16>, vector<288x128xbf16>, vector<128x128xf32> -> vector<128x128xf32>
    %cst_4 = arith.constant dense<0.000000e+00> : vector<128xf32>
    %4 = vector.multi_reduction <add>, %3, %cst_4 [0] : vector<128x128xf32> to vector<128xf32>
    %5 = vector.shape_cast %4 : vector<128xf32> to vector<1x128xf32>
    %cst_5 = arith.constant 7.812500e-03 : f32
    %6 = vector.broadcast %cst_5 : f32 to vector<1x128xf32>
    %7 = arith.mulf %5, %6 : vector<1x128xf32>
    %8 = vector.broadcast %7 : vector<1x128xf32> to vector<128x128xf32>
    %9 = arith.subf %3, %8 : vector<128x128xf32>
    %10 = arith.mulf %9, %9 : vector<128x128xf32>
    %cst_6 = arith.constant dense<0.000000e+00> : vector<128xf32>
    %11 = vector.multi_reduction <add>, %10, %cst_6 [0] : vector<128x128xf32> to vector<128xf32>
    %12 = vector.shape_cast %11 : vector<128xf32> to vector<1x128xf32>
    %cst_7 = arith.constant 7.812500e-03 : f32
    %13 = vector.broadcast %cst_7 : f32 to vector<1x128xf32>
    %14 = arith.mulf %12, %13 : vector<1x128xf32>
    %c0_8 = arith.constant 0 : index
    %c0_9 = arith.constant 0 : index
    %15 = vector.load %arg3[%c0_8, %c0_9] : memref<1x128xf32, #tpu.memory_space<vmem>>, vector<1x128xf32>
    %cst_10 = arith.constant 9.99999974E-6 : f32
    %16 = vector.broadcast %cst_10 : f32 to vector<1x128xf32>
    %17 = arith.addf %14, %16 : vector<1x128xf32>
    %18 = math.rsqrt %17 : vector<1x128xf32>
    %19 = arith.mulf %15, %18 : vector<1x128xf32>
    %20 = vector.broadcast %19 : vector<1x128xf32> to vector<128x128xf32>
    %21 = arith.mulf %9, %20 : vector<128x128xf32>
    %c0_11 = arith.constant 0 : index
    %c0_12 = arith.constant 0 : index
    %22 = vector.load %arg4[%c0_11, %c0_12] : memref<1x128xf32, #tpu.memory_space<vmem>>, vector<1x128xf32>
    %23 = vector.broadcast %22 : vector<1x128xf32> to vector<128x128xf32>
    %24 = arith.addf %21, %23 : vector<128x128xf32>
    %cst_13 = arith.constant 0.000000e+00 : f32
    %25 = vector.broadcast %cst_13 : f32 to vector<128x128xf32>
    %26 = arith.maximumf %24, %25 : vector<128x128xf32>
    %27 = vector.extract_strided_slice %26 {offsets = [0, 0], sizes = [32, 128], strides = [1, 1]} : vector<128x128xf32> to vector<32x128xf32>
    %28 = vector.extract_strided_slice %26 {offsets = [32, 0], sizes = [32, 128], strides = [1, 1]} : vector<128x128xf32> to vector<32x128xf32>
    %29 = arith.maximumf %27, %28 : vector<32x128xf32>
    %30 = vector.extract_strided_slice %26 {offsets = [64, 0], sizes = [32, 128], strides = [1, 1]} : vector<128x128xf32> to vector<32x128xf32>
    %31 = vector.extract_strided_slice %26 {offsets = [96, 0], sizes = [32, 128], strides = [1, 1]} : vector<128x128xf32> to vector<32x128xf32>
    %32 = arith.maximumf %30, %31 : vector<32x128xf32>
    %33 = arith.maximumf %29, %32 : vector<32x128xf32>
    %34 = arith.truncf %33 : vector<32x128xf32> to vector<32x128xbf16>
    %c0_14 = arith.constant 0 : index
    %c0_15 = arith.constant 0 : index
    %c0_16 = arith.constant 0 : index
    %35 = vector.load %arg5[%c0_14, %c0_15, %c0_16] : memref<1x32x128xbf16, #tpu.memory_space<vmem>>, vector<1x32x128xbf16>
    %36 = vector.shape_cast %35 : vector<1x32x128xbf16> to vector<32x128xbf16>
    %37 = vector.shape_cast %34 : vector<32x128xbf16> to vector<1x32x128xbf16>
    tpu.vector_store %arg5[%c0_14, %c0_15, %c0_16], %37 {strides = array<i32>} : memref<1x32x128xbf16, #tpu.memory_space<vmem>>, vector<1x32x128xbf16>,
    return
  }
  func.func @transform_0(%arg0: i32) -> (i32, i32, i32) {
    %c0_i32 = arith.constant 0 : i32
    %c0_i32_0 = arith.constant 0 : i32
    %c0_i32_1 = arith.constant 0 : i32
    return %arg0, %c0_i32, %c0_i32_0 : i32, i32, i32
  }
  func.func @transform_1(%arg0: i32) -> (i32, i32) {
    %c0_i32 = arith.constant 0 : i32
    %c0_i32_0 = arith.constant 0 : i32
    %c0_i32_1 = arith.constant 0 : i32
    return %c0_i32, %c0_i32_0 : i32, i32
  }
  func.func @transform_2(%arg0: i32) -> (i32, i32) {
    %c0_i32 = arith.constant 0 : i32
    %c0_i32_0 = arith.constant 0 : i32
    %c0_i32_1 = arith.constant 0 : i32
    return %c0_i32, %c0_i32_0 : i32, i32
  }
  func.func @transform_3(%arg0: i32) -> (i32, i32) {
    %c0_i32 = arith.constant 0 : i32
    %c0_i32_0 = arith.constant 0 : i32
    %c0_i32_1 = arith.constant 0 : i32
    return %c0_i32, %c0_i32_0 : i32, i32
  }
  func.func @transform_4(%arg0: i32) -> (i32, i32, i32) {
    %c0_i32 = arith.constant 0 : i32
    %c0_i32_0 = arith.constant 0 : i32
    %c0_i32_1 = arith.constant 0 : i32
    return %arg0, %c0_i32, %c0_i32_0 : i32, i32, i32
  }
}

module attributes {stable_mosaic.version = 11 : i64} {
  func.func @conv3_head_kernel(%arg0: i32, %arg1: memref<1x32x576xbf16, #tpu.memory_space<vmem>>, %arg2: memref<576x128xbf16, #tpu.memory_space<vmem>>, %arg3: memref<1x128xf32, #tpu.memory_space<vmem>>, %arg4: memref<1x128xf32, #tpu.memory_space<vmem>>, %arg5: memref<128x128xf32, #tpu.memory_space<vmem>>, %arg6: memref<1x128xf32, #tpu.memory_space<vmem>>, %arg7: memref<128x128xf32, #tpu.memory_space<vmem>>, %arg8: memref<1x128xf32, #tpu.memory_space<vmem>>, %arg9: memref<1x2x128xf32, #tpu.memory_space<vmem>>) attributes {dimension_semantics = [#tpu.dimension_semantics<parallel>], iteration_bounds = array<i64: 2>, scalar_prefetch = 0 : i64, scratch_operands = 0 : i64, tpu.core_type = #tpu.core_type<tc>, window_params = [{transform_indices = @transform_0, window_bounds = array<i64: 1, 32, 576>}, {pipeline_mode = #tpu.pipeline_mode<synchronous>, transform_indices = @transform_1, window_bounds = array<i64: 576, 128>}, {pipeline_mode = #tpu.pipeline_mode<synchronous>, transform_indices = @transform_2, window_bounds = array<i64: 1, 128>}, {pipeline_mode = #tpu.pipeline_mode<synchronous>, transform_indices = @transform_3, window_bounds = array<i64: 1, 128>}, {pipeline_mode = #tpu.pipeline_mode<synchronous>, transform_indices = @transform_4, window_bounds = array<i64: 128, 128>}, {pipeline_mode = #tpu.pipeline_mode<synchronous>, transform_indices = @transform_5, window_bounds = array<i64: 1, 128>}, {pipeline_mode = #tpu.pipeline_mode<synchronous>, transform_indices = @transform_6, window_bounds = array<i64: 128, 128>}, {pipeline_mode = #tpu.pipeline_mode<synchronous>, transform_indices = @transform_7, window_bounds = array<i64: 1, 128>}, {transform_indices = @transform_8, window_bounds = array<i64: 1, 2, 128>}]} {
    %c0 = arith.constant 0 : index
    %c0_0 = arith.constant 0 : index
    %c0_1 = arith.constant 0 : index
    %0 = vector.load %arg1[%c0, %c0_0, %c0_1] : memref<1x32x576xbf16, #tpu.memory_space<vmem>>, vector<1x32x576xbf16>
    %1 = vector.shape_cast %0 : vector<1x32x576xbf16> to vector<32x576xbf16>
    %c0_2 = arith.constant 0 : index
    %c0_3 = arith.constant 0 : index
    %2 = vector.load %arg2[%c0_2, %c0_3] : memref<576x128xbf16, #tpu.memory_space<vmem>>, vector<576x128xbf16>
    %cst = arith.constant dense<0.000000e+00> : vector<32x128xf32>
    %3 = tpu.matmul %1, %2, %cst {dimension_numbers = #tpu.dot_dimension_numbers<[1], [0], [0], [1], [0, 0, 1, 1], [], []>} : vector<32x576xbf16>, vector<576x128xbf16>, vector<32x128xf32> -> vector<32x128xf32>
    %cst_4 = arith.constant dense<0.000000e+00> : vector<128xf32>
    %4 = vector.multi_reduction <add>, %3, %cst_4 [0] : vector<32x128xf32> to vector<128xf32>
    %5 = vector.shape_cast %4 : vector<128xf32> to vector<1x128xf32>
    %cst_5 = arith.constant 3.125000e-02 : f32
    %6 = vector.broadcast %cst_5 : f32 to vector<1x128xf32>
    %7 = arith.mulf %5, %6 : vector<1x128xf32>
    %8 = vector.broadcast %7 : vector<1x128xf32> to vector<32x128xf32>
    %9 = arith.subf %3, %8 : vector<32x128xf32>
    %10 = arith.mulf %9, %9 : vector<32x128xf32>
    %cst_6 = arith.constant dense<0.000000e+00> : vector<128xf32>
    %11 = vector.multi_reduction <add>, %10, %cst_6 [0] : vector<32x128xf32> to vector<128xf32>
    %12 = vector.shape_cast %11 : vector<128xf32> to vector<1x128xf32>
    %cst_7 = arith.constant 3.125000e-02 : f32
    %13 = vector.broadcast %cst_7 : f32 to vector<1x128xf32>
    %14 = arith.mulf %12, %13 : vector<1x128xf32>
    %c0_8 = arith.constant 0 : index
    %c0_9 = arith.constant 0 : index
    %15 = vector.load %arg3[%c0_8, %c0_9] : memref<1x128xf32, #tpu.memory_space<vmem>>, vector<1x128xf32>
    %cst_10 = arith.constant 9.99999974E-6 : f32
    %16 = vector.broadcast %cst_10 : f32 to vector<1x128xf32>
    %17 = arith.addf %14, %16 : vector<1x128xf32>
    %18 = math.rsqrt %17 : vector<1x128xf32>
    %19 = arith.mulf %15, %18 : vector<1x128xf32>
    %20 = vector.broadcast %19 : vector<1x128xf32> to vector<32x128xf32>
    %21 = arith.mulf %9, %20 : vector<32x128xf32>
    %c0_11 = arith.constant 0 : index
    %c0_12 = arith.constant 0 : index
    %22 = vector.load %arg4[%c0_11, %c0_12] : memref<1x128xf32, #tpu.memory_space<vmem>>, vector<1x128xf32>
    %23 = vector.broadcast %22 : vector<1x128xf32> to vector<32x128xf32>
    %24 = arith.addf %21, %23 : vector<32x128xf32>
    %cst_13 = arith.constant 0.000000e+00 : f32
    %25 = vector.broadcast %cst_13 : f32 to vector<32x128xf32>
    %26 = arith.maximumf %24, %25 : vector<32x128xf32>
    %27 = vector.extract_strided_slice %26 {offsets = [0, 0], sizes = [8, 128], strides = [1, 1]} : vector<32x128xf32> to vector<8x128xf32>
    %28 = vector.extract_strided_slice %26 {offsets = [8, 0], sizes = [8, 128], strides = [1, 1]} : vector<32x128xf32> to vector<8x128xf32>
    %29 = arith.maximumf %27, %28 : vector<8x128xf32>
    %30 = vector.extract_strided_slice %26 {offsets = [16, 0], sizes = [8, 128], strides = [1, 1]} : vector<32x128xf32> to vector<8x128xf32>
    %31 = vector.extract_strided_slice %26 {offsets = [24, 0], sizes = [8, 128], strides = [1, 1]} : vector<32x128xf32> to vector<8x128xf32>
    %32 = arith.maximumf %30, %31 : vector<8x128xf32>
    %33 = arith.maximumf %29, %32 : vector<8x128xf32>
    %34 = vector.shape_cast %33 : vector<8x128xf32> to vector<2x4x128xf32>
    %cst_14 = arith.constant dense<0.000000e+00> : vector<2x128xf32>
    %35 = vector.multi_reduction <add>, %34, %cst_14 [1] : vector<2x4x128xf32> to vector<2x128xf32>
    %cst_15 = arith.constant 4.000000e+00 : f32
    %36 = vector.broadcast %cst_15 : f32 to vector<2x128xf32>
    %37 = arith.divf %35, %36 : vector<2x128xf32>
    %c0_16 = arith.constant 0 : index
    %c0_17 = arith.constant 0 : index
    %38 = vector.load %arg5[%c0_16, %c0_17] : memref<128x128xf32, #tpu.memory_space<vmem>>, vector<128x128xf32>
    %cst_18 = arith.constant dense<0.000000e+00> : vector<2x128xf32>
    %39 = tpu.matmul %37, %38, %cst_18 {dimension_numbers = #tpu.dot_dimension_numbers<[1], [0], [0], [1], [0, 0, 1, 1], [], []>} : vector<2x128xf32>, vector<128x128xf32>, vector<2x128xf32> -> vector<2x128xf32>
    %c0_19 = arith.constant 0 : index
    %c0_20 = arith.constant 0 : index
    %40 = vector.load %arg6[%c0_19, %c0_20] : memref<1x128xf32, #tpu.memory_space<vmem>>, vector<1x128xf32>
    %41 = vector.broadcast %40 : vector<1x128xf32> to vector<2x128xf32>
    %42 = arith.addf %39, %41 : vector<2x128xf32>
    %cst_21 = arith.constant 0.000000e+00 : f32
    %43 = vector.broadcast %cst_21 : f32 to vector<2x128xf32>
    %44 = arith.maximumf %42, %43 : vector<2x128xf32>
    %c0_22 = arith.constant 0 : index
    %c0_23 = arith.constant 0 : index
    %45 = vector.load %arg7[%c0_22, %c0_23] : memref<128x128xf32, #tpu.memory_space<vmem>>, vector<128x128xf32>
    %cst_24 = arith.constant dense<0.000000e+00> : vector<2x128xf32>
    %46 = tpu.matmul %44, %45, %cst_24 {dimension_numbers = #tpu.dot_dimension_numbers<[1], [0], [0], [1], [0, 0, 1, 1], [], []>} : vector<2x128xf32>, vector<128x128xf32>, vector<2x128xf32> -> vector<2x128xf32>
    %c0_25 = arith.constant 0 : index
    %c0_26 = arith.constant 0 : index
    %47 = vector.load %arg8[%c0_25, %c0_26] : memref<1x128xf32, #tpu.memory_space<vmem>>, vector<1x128xf32>
    %48 = vector.broadcast %47 : vector<1x128xf32> to vector<2x128xf32>
    %49 = arith.addf %46, %48 : vector<2x128xf32>
    %c0_27 = arith.constant 0 : index
    %c0_28 = arith.constant 0 : index
    %c0_29 = arith.constant 0 : index
    %50 = vector.load %arg9[%c0_27, %c0_28, %c0_29] : memref<1x2x128xf32, #tpu.memory_space<vmem>>, vector<1x2x128xf32>
    %51 = vector.shape_cast %50 : vector<1x2x128xf32> to vector<2x128xf32>
    %52 = vector.shape_cast %49 : vector<2x128xf32> to vector<1x2x128xf32>
    tpu.vector_store %arg9[%c0_27, %c0_28, %c0_29], %52 {strides = array<i32>} : memref<1x2x128xf32, #tpu.memory_space<vmem>>, vector<1x2x128xf32>,
    return
  }
  func.func @transform_0(%arg0: i32) -> (i32, i32, i32) {
    %c0_i32 = arith.constant 0 : i32
    %c0_i32_0 = arith.constant 0 : i32
    %c0_i32_1 = arith.constant 0 : i32
    return %arg0, %c0_i32, %c0_i32_0 : i32, i32, i32
  }
  func.func @transform_1(%arg0: i32) -> (i32, i32) {
    %c0_i32 = arith.constant 0 : i32
    %c0_i32_0 = arith.constant 0 : i32
    %c0_i32_1 = arith.constant 0 : i32
    return %c0_i32, %c0_i32_0 : i32, i32
  }
  func.func @transform_2(%arg0: i32) -> (i32, i32) {
    %c0_i32 = arith.constant 0 : i32
    %c0_i32_0 = arith.constant 0 : i32
    %c0_i32_1 = arith.constant 0 : i32
    return %c0_i32, %c0_i32_0 : i32, i32
  }
  func.func @transform_3(%arg0: i32) -> (i32, i32) {
    %c0_i32 = arith.constant 0 : i32
    %c0_i32_0 = arith.constant 0 : i32
    %c0_i32_1 = arith.constant 0 : i32
    return %c0_i32, %c0_i32_0 : i32, i32
  }
  func.func @transform_4(%arg0: i32) -> (i32, i32) {
    %c0_i32 = arith.constant 0 : i32
    %c0_i32_0 = arith.constant 0 : i32
    %c0_i32_1 = arith.constant 0 : i32
    return %c0_i32, %c0_i32_0 : i32, i32
  }
  func.func @transform_5(%arg0: i32) -> (i32, i32) {
    %c0_i32 = arith.constant 0 : i32
    %c0_i32_0 = arith.constant 0 : i32
    %c0_i32_1 = arith.constant 0 : i32
    return %c0_i32, %c0_i32_0 : i32, i32
  }
  func.func @transform_6(%arg0: i32) -> (i32, i32) {
    %c0_i32 = arith.constant 0 : i32
    %c0_i32_0 = arith.constant 0 : i32
    %c0_i32_1 = arith.constant 0 : i32
    return %c0_i32, %c0_i32_0 : i32, i32
  }
  func.func @transform_7(%arg0: i32) -> (i32, i32) {
    %c0_i32 = arith.constant 0 : i32
    %c0_i32_0 = arith.constant 0 : i32
    %c0_i32_1 = arith.constant 0 : i32
    return %c0_i32, %c0_i32_0 : i32, i32
  }
  func.func @transform_8(%arg0: i32) -> (i32, i32, i32) {
    %c0_i32 = arith.constant 0 : i32
    %c0_i32_0 = arith.constant 0 : i32
    %c0_i32_1 = arith.constant 0 : i32
    return %arg0, %c0_i32, %c0_i32_0 : i32, i32, i32
  }
}

</mosaic_0001>

<bundles_post_ra>
// kernel: _lambda_.3
= control target key start
LH: loop header
LB: loop body
LE: loop exit
PB: predicated region body
PF: predicated region fallthrough
CT: control target
= control target key end

     0   :  { %s1812_s15 = smov 0   ;;  %s3098_s0 = inlined_call_operand.vmem [shape: bf16[2,512,16], index: 0, kind: input, shape index: {}]   ;;  %s3099_s1 = inlined_call_operand.vmem [shape: bf16[16,128], index: 1, kind: input, shape index: {}]   ;;  %s3100_s2 = inlined_call_operand.vmem [shape: f32[1,128], index: 2, kind: input, shape index: {}]   ;;  %s3101_s3 = inlined_call_operand.vmem [shape: f32[1,128], index: 3, kind: input, shape index: {}]   ;;  %s3102_s4 = inlined_call_operand.vmem [shape: bf16[2,128,128], index: 4, kind: output, shape index: {}]  }
   0x1 LB: > { %s1477_s16 = sadd.s32 4294967295, %s1785_s15   ;;  %p1481_p0 = scmp.ge.s32.totalorder %s1785_s15, 1  ;;  %s1785_s15 = sphi %s1812_s15, %s14_s15  }
   0x2   : > { %p162_p1 = scmp.lt.s32.totalorder %s1785_s15, 3 }
   0x4   : > { %p163_p2 = pnand %p1481_p0, %p162_p1 }
   0x6   : > { %166 = sbr.rel (%p163_p2) target bundleno = 624 (0x270), region = 36 }
   0xd   : > { %v1744_v0 = vld [vmem:[%s3099_s1] sm:$0xff]   ;;  %p188_p3 = scmp.lt.s32.totalorder %s1477_s16, 1  ;;  %vm431_vm0 = vcmask 130048  }
   0xe   : > { %1668 = vmatprep.subr.bf16.mxu0 %v1744_v0  ;;  %1734 = vmatprep.subr.bf16.mxu1 %v1744_v0 }
   0xf   : > { %s3318_s16 = smov (!%p188_p3, %s1477_s16), 1  ;;  %1669 = vmatpush3.bf16.msra.mxu0 %v1744_v0  ;;  %1735 = vmatpush3.bf16.msra.mxu1 %v1744_v0 }
  0x10   : > { %s1570_s19 = sshll.u32 %s3318_s16, 8  ;;  %s1571_s27 = sshll.u32 %s3318_s16, 6 }
  0x11   : > { %s1829_s22 = scalar_lea.vmem %s3098_s0, %s1570_s19  ;;  %s197_s30 = scalar_lea.vmem %s3102_s4, %s1571_s27 }
  0x12   : > { %v1745_v1 = vld [vmem:[%s1829_s22] sm:$0xff]   ;;  %v1746_v2 = vld [vmem:[%s1829_s22 + $0x8] sm:$0xff]   ;;  %v1747_v3 = vld [vmem:[%s1829_s22 + $0x10] sm:$0xff]  }
  0x13   : > { %1670 = vmatprep.mubr.msk.bf16.mxu0 %vm431_vm0, %v1745_v1  ;;  %v1748_v4 = vld [vmem:[%s1829_s22 + $0x18] sm:$0xff]   ;;  %v1749_v5 = vld [vmem:[%s1829_s22 + $0x20] sm:$0xff]   ;;  %v1750_v6 = vld [vmem:[%s1829_s22 + $0x28] sm:$0xff]  }
  0x14   : > { %1671 = vmatmul.mubr.msk.bf16.vlgmr.msra.gmra.mrb[0].mxu0 %vm431_vm0, %v1746_v2  ;;  %v1751_v7 = vld [vmem:[%s1829_s22 + $0x30] sm:$0xff]   ;;  %v1761_v8 = vld [vmem:[%s1829_s22 + $0x80] sm:$0xff]   ;;  %v1762_v9 = vld [vmem:[%s1829_s22 + $0x88] sm:$0xff]  }
  0x15   : > { %1674 = vmatprep.mubr.msk.bf16.mxu0 %vm431_vm0, %v1747_v3  ;;  %1702 = vmatprep.mubr.msk.bf16.mxu1 %vm431_vm0, %v1761_v8  ;;  %v1763_v10 = vld [vmem:[%s1829_s22 + $0x90] sm:$0xff]   ;;  %v1752_v11 = vld [vmem:[%s1829_s22 + $0x38] sm:$0xff]   ;;  %v1753_v12 = vld [vmem:[%s1829_s22 + $0x40] sm:$0xff]  }
  0x16   : > { %1703 = vmatmul.mubr.msk.bf16.vlgmr.msra.gmra.mrb[0].mxu1 %vm431_vm0, %v1762_v9  ;;  %v1764_v13 = vld [vmem:[%s1829_s22 + $0x98] sm:$0xff]   ;;  %v1765_v14 = vld [vmem:[%s1829_s22 + $0xa0] sm:$0xff]   ;;  %v1754_v15 = vld [vmem:[%s1829_s22 + $0x48] sm:$0xff]  }
  0x17   : > { %1706 = vmatprep.mubr.msk.bf16.mxu1 %vm431_vm0, %v1763_v10  ;;  %v1766_v16 = vld [vmem:[%s1829_s22 + $0xa8] sm:$0xff]   ;;  %v1755_v17 = vld [vmem:[%s1829_s22 + $0x50] sm:$0xff]   ;;  %v1756_v19 = vld [vmem:[%s1829_s22 + $0x58] sm:$0xff]  }
  0x18   : > { %v1767_v18 = vld [vmem:[%s1829_s22 + $0xb0] sm:$0xff]   ;;  %v1768_v20 = vld [vmem:[%s1829_s22 + $0xb8] sm:$0xff]   ;;  %v1757_v21 = vld [vmem:[%s1829_s22 + $0x60] sm:$0xff]  }
  0x19   : > { %v1769_v22 = vld [vmem:[%s1829_s22 + $0xc0] sm:$0xff]   ;;  %v1758_v23 = vld [vmem:[%s1829_s22 + $0x68] sm:$0xff]   ;;  %v1759_v25 = vld [vmem:[%s1829_s22 + $0x70] sm:$0xff]  }
  0x1a   : > { %v1770_v24 = vld [vmem:[%s1829_s22 + $0xc8] sm:$0xff]   ;;  %v1771_v26 = vld [vmem:[%s1829_s22 + $0xd0] sm:$0xff]   ;;  %v1760_v27 = vld [vmem:[%s1829_s22 + $0x78] sm:$0xff]  }
  0x1b   : > { %v1772_v28 = vld [vmem:[%s1829_s22 + $0xd8] sm:$0xff]   ;;  %v1773_v29 = vld [vmem:[%s1829_s22 + $0xe0] sm:$0xff]   ;;  %v1774_v30 = vld [vmem:[%s1829_s22 + $0xe8] sm:$0xff]  }
  0x1c   : > { %1675 = vmatmul.mubr.msk.bf16.gmra.mrb[4].mxu0 %vm431_vm0, %v1748_v4  ;;  %v1775_v31 = vld [vmem:[%s1829_s22 + $0xf0] sm:$0xff]   ;;  %v1776_v32 = vld [vmem:[%s1829_s22 + $0xf8] sm:$0xff]  }
  0x1d   : > { %1678 = vmatprep.mubr.msk.bf16.mxu0 %vm431_vm0, %v1749_v5 }
  0x1e   : > { %1707 = vmatmul.mubr.msk.bf16.gmra.mrb[4].mxu1 %vm431_vm0, %v1764_v13 }
  0x1f   : > { %1710 = vmatprep.mubr.msk.bf16.mxu1 %vm431_vm0, %v1765_v14 }
  0x24   : > { %1679 = vmatmul.mubr.msk.bf16.gmra.mrb[8].mxu0 %vm431_vm0, %v1750_v6 }
  0x25   : > { %1682 = vmatprep.mubr.msk.bf16.mxu0 %vm431_vm0, %v1751_v7 }
  0x26   : > { %1711 = vmatmul.mubr.msk.bf16.gmra.mrb[8].mxu1 %vm431_vm0, %v1766_v16 }
  0x27   : > { %1714 = vmatprep.mubr.msk.bf16.mxu1 %vm431_vm0, %v1767_v18 }
  0x2c   : > { %1683 = vmatmul.mubr.msk.bf16.gmra.mrb[12].mxu0 %vm431_vm0, %v1752_v11 }
  0x2d   : > { %1686 = vmatprep.mubr.msk.bf16.mxu0 %vm431_vm0, %v1753_v12 }
  0x2e   : > { %1715 = vmatmul.mubr.msk.bf16.gmra.mrb[12].mxu1 %vm431_vm0, %v1768_v20 }
  0x2f   : > { %1718 = vmatprep.mubr.msk.bf16.mxu1 %vm431_vm0, %v1769_v22 }
  0x34   : > { %1687 = vmatmul.mubr.msk.bf16.gmra.mrb[16].mxu0 %vm431_vm0, %v1754_v15 }
  0x35   : > { %1690 = vmatprep.mubr.msk.bf16.mxu0 %vm431_vm0, %v1755_v17 }
  0x36   : > { %1719 = vmatmul.mubr.msk.bf16.gmra.mrb[16].mxu1 %vm431_vm0, %v1770_v24 }
  0x37   : > { %1722 = vmatprep.mubr.msk.bf16.mxu1 %vm431_vm0, %v1771_v26 }
  0x3c   : > { %1691 = vmatmul.mubr.msk.bf16.gmra.mrb[20].mxu0 %vm431_vm0, %v1756_v19 }
  0x3d   : > { %1694 = vmatprep.mubr.msk.bf16.mxu0 %vm431_vm0, %v1757_v21 }
  0x3e   : > { %1723 = vmatmul.mubr.msk.bf16.gmra.mrb[20].mxu1 %vm431_vm0, %v1772_v28 }
  0x3f   : > { %1726 = vmatprep.mubr.msk.bf16.mxu1 %vm431_vm0, %v1773_v29 }
  0x44   : > { %1695 = vmatmul.mubr.msk.bf16.gmra.mrb[24].mxu0 %vm431_vm0, %v1758_v23 }
  0x45   : > { %1698 = vmatprep.mubr.msk.bf16.mxu0 %vm431_vm0, %v1759_v25 }
  0x46   : > { %1727 = vmatmul.mubr.msk.bf16.gmra.mrb[24].mxu1 %vm431_vm0, %v1774_v30 }
  0x47   : > { %1730 = vmatprep.mubr.msk.bf16.mxu1 %vm431_vm0, %v1775_v31 }
  0x4c   : > { %1699 = vmatmul.mubr.msk.bf16.gmra.mrb[28].mxu0 %vm431_vm0, %v1760_v27 }
  0x4e   : > { %1731 = vmatmul.mubr.msk.bf16.gmra.mrb[28].mxu1 %vm431_vm0, %v1776_v32 }
  0xe7   : > { %v1895_v33 = vpop.f32.mrb[0].mxu0 }
  0xe8   : > { %v1897_v34 = vpop.f32.mrb[1].mxu0 }
  0xe9   : > { %v1899_v35 = vpop.f32.mrb[2].mxu0  ;;  %v1921_v49 = vpop.f32.mrb[0].mxu1 }
  0xea   : > { %v1901_v36 = vpop.f32.mrb[3].mxu0  ;;  %3156 = vst [vmem:[#allocation2_spill] sm:$0xff] %v1921_v49  ;;  %v1925_v51 = vpop.f32.mrb[1].mxu1 }
  0xeb   : > { %v817_v37 = vadd.f32 %v1901_v36, %v1897_v34  ;;  %3157 = vst [vmem:[#allocation3_spill] sm:$0xff] %v1925_v51  ;;  %v1930_v54 = vpop.f32.mrb[2].mxu1 }
  0xec   : > { %3158 = vst [vmem:[#allocation4_spill] sm:$0xff] %v1930_v54  ;;  %v1934_v56 = vpop.f32.mrb[3].mxu1 }
  0xed   : > { %v818_v38 = vadd.f32 %v1895_v33, %v817_v37  ;;  %3159 = vst [vmem:[#allocation5_spill] sm:$0xff] %v1934_v56 }
  0xef   : > { %v1906_v39 = vpop.f32.mrb[4].mxu0  ;;  %v819_v40 = vadd.f32 %v1899_v35, %v818_v38 }
  0xf0   : > { %v1909_v41 = vpop.f32.mrb[5].mxu0 }
  0xf1   : > { %v820_v42 = vadd.f32 %v819_v40, %v1909_v41  ;;  %v1912_v43 = vpop.f32.mrb[6].mxu0  ;;  %v1941_v61 = vpop.f32.mrb[4].mxu1 }
  0xf2   : > { %v1914_v44 = vpop.f32.mrb[7].mxu0  ;;  %v1945_v63 = vpop.f32.mrb[5].mxu1 }
  0xf3   : > { %v821_v45 = vadd.f32 %v820_v42, %v1914_v44  ;;  %3160 = vst [vmem:[#allocation6_spill] sm:$0xff] %v1945_v63  ;;  %v1950_v2 = vpop.f32.mrb[6].mxu1 }
  0xf4   : > { %v1954_v4 = vpop.f32.mrb[7].mxu1 }
  0xf5   : > { %v822_v46 = vadd.f32 %v1906_v39, %v821_v45 }
  0xf7   : > { %v1918_v47 = vpop.f32.mrb[8].mxu0  ;;  %v823_v48 = vadd.f32 %v1912_v43, %v822_v46 }
  0xf8   : > { %v1923_v50 = vpop.f32.mrb[9].mxu0 }
  0xf9   : > { %v824_v52 = vadd.f32 %v823_v48, %v1923_v50  ;;  %v1928_v53 = vpop.f32.mrb[10].mxu0  ;;  %v1961_v9 = vpop.f32.mrb[8].mxu1 }
  0xfa   : > { %v1932_v55 = vpop.f32.mrb[11].mxu0  ;;  %v1965_v11 = vpop.f32.mrb[9].mxu1 }
  0xfb   : > { %v825_v57 = vadd.f32 %v824_v52, %v1932_v55  ;;  %v1970_v14 = vpop.f32.mrb[10].mxu1 }
  0xfc   : > { %v1974_v16 = vpop.f32.mrb[11].mxu1 }
  0xfd   : > { %v826_v58 = vadd.f32 %v1918_v47, %v825_v57 }
  0xff   : > { %v1938_v59 = vpop.f32.mrb[12].mxu0  ;;  %v827_v60 = vadd.f32 %v1928_v53, %v826_v58 }
 0x100   : > { %v1943_v62 = vpop.f32.mrb[13].mxu0 }
 0x101   : > { %v828_v0 = vadd.f32 %v827_v60, %v1943_v62  ;;  %v1948_v1 = vpop.f32.mrb[14].mxu0  ;;  %v1981_v21 = vpop.f32.mrb[12].mxu1 }
 0x102   : > { %v1952_v3 = vpop.f32.mrb[15].mxu0  ;;  %v1985_v23 = vpop.f32.mrb[13].mxu1 }
 0x103   : > { %v829_v5 = vadd.f32 %v828_v0, %v1952_v3  ;;  %v1990_v26 = vpop.f32.mrb[14].mxu1 }
 0x104   : > { %v1994_v28 = vpop.f32.mrb[15].mxu1 }
 0x105   : > { %v830_v6 = vadd.f32 %v1938_v59, %v829_v5 }
 0x107   : > { %v1958_v7 = vpop.f32.mrb[16].mxu0  ;;  %v831_v8 = vadd.f32 %v1948_v1, %v830_v6 }
 0x108   : > { %v1963_v10 = vpop.f32.mrb[17].mxu0 }
 0x109   : > { %v832_v12 = vadd.f32 %v831_v8, %v1963_v10  ;;  %v1968_v13 = vpop.f32.mrb[18].mxu0  ;;  %v2001_v37 = vpop.f32.mrb[16].mxu1 }
 0x10a   : > { %v1972_v15 = vpop.f32.mrb[19].mxu0  ;;  %v2005_v40 = vpop.f32.mrb[17].mxu1 }
 0x10b   : > { %v833_v17 = vadd.f32 %v832_v12, %v1972_v15  ;;  %v2010_v46 = vpop.f32.mrb[18].mxu1 }
 0x10c   : > { %v2014_v52 = vpop.f32.mrb[19].mxu1 }
 0x10d   : > { %v834_v18 = vadd.f32 %v1958_v7, %v833_v17 }
 0x10f   : > { %v1978_v19 = vpop.f32.mrb[20].mxu0  ;;  %v835_v20 = vadd.f32 %v1968_v13, %v834_v18 }
 0x110   : > { %v1983_v22 = vpop.f32.mrb[21].mxu0 }
 0x111   : > { %v836_v24 = vadd.f32 %v835_v20, %v1983_v22  ;;  %v1988_v25 = vpop.f32.mrb[22].mxu0  ;;  %v2021_v5 = vpop.f32.mrb[20].mxu1 }
 0x112   : > { %v1992_v27 = vpop.f32.mrb[23].mxu0  ;;  %3164 = vst [vmem:[#allocation10_spill] sm:$0xff] %v2021_v5  ;;  %v2025_v8 = vpop.f32.mrb[21].mxu1 }
 0x113   : > { %v837_v29 = vadd.f32 %v836_v24, %v1992_v27  ;;  %v2030_v18 = vpop.f32.mrb[22].mxu1 }
 0x114   : > { %3167 = vst [vmem:[#allocation13_spill] sm:$0xff] %v2030_v18  ;;  %v2034_v24 = vpop.f32.mrb[23].mxu1 }
 0x115   : > { %v838_v30 = vadd.f32 %v1978_v19, %v837_v29  ;;  %3169 = vst [vmem:[#allocation15_spill] sm:$0xff] %v2034_v24 }
 0x117   : > { %v1998_v31 = vpop.f32.mrb[24].mxu0  ;;  %v839_v32 = vadd.f32 %v1988_v25, %v838_v30 }
 0x118   : > { %3161 = vst [vmem:[#allocation7_spill] sm:$0xff] %v1998_v31  ;;  %v2003_v38 = vpop.f32.mrb[25].mxu0 }
 0x119   : > { %v840_v42 = vadd.f32 %v839_v32, %v2003_v38  ;;  %v2008_v45 = vpop.f32.mrb[26].mxu0 }
 0x11a   : > { %3162 = vst [vmem:[#allocation8_spill] sm:$0xff] %v2008_v45  ;;  %v2012_v48 = vpop.f32.mrb[27].mxu0 }
 0x11b   : > { %v841_v57 = vadd.f32 %v840_v42, %v2012_v48  ;;  %v2039_v42 = vpop.f32.mrb[24].mxu1 }
 0x11d   : > { %v842_v58 = vadd.f32 %v1998_v31, %v841_v57  ;;  %v2041_v57 = vpop.f32.mrb[25].mxu1 }
 0x11e   : > { %3170 = vst [vmem:[#allocation16_spill] sm:$0xff] %v2041_v57 }
 0x11f   : > { %v2018_v60 = vpop.f32.mrb[28].mxu0  ;;  %v843_v0 = vadd.f32 %v2008_v45, %v842_v58 }
 0x120   : > { %3163 = vst [vmem:[#allocation9_spill] sm:$0xff] %v2018_v60  ;;  %v2023_v6 = vpop.f32.mrb[29].mxu0 }
 0x121   : > { %3165 = vst [vmem:[#allocation11_spill] sm:$0xff] %v2023_v6  ;;  %v844_v12 = vadd.f32 %v843_v0, %v2023_v6  ;;  %v2028_v17 = vpop.f32.mrb[30].mxu0  ;;  %v2044_v0 = vpop.f32.mrb[26].mxu1 }
 0x122   : > { %3166 = vst [vmem:[#allocation12_spill] sm:$0xff] %v2028_v17  ;;  %v2032_v20 = vpop.f32.mrb[31].mxu0  ;;  %v2046_v6 = vpop.f32.mrb[27].mxu1 }
 0x123   : > { %3168 = vst [vmem:[#allocation14_spill] sm:$0xff] %v2032_v20  ;;  %v845_v29 = vadd.f32 %v844_v12, %v2032_v20  ;;  %v2051_v20 = vpop.f32.mrb[28].mxu1 }
 0x125   : > { %v846_v30 = vadd.f32 %v2018_v60, %v845_v29  ;;  %v2053_v29 = vpop.f32.mrb[29].mxu1 }
 0x127   : > { %v847_v32 = vadd.f32 %v2028_v17, %v846_v30  ;;  %v2056_v17 = vpop.f32.mrb[30].mxu1 }
 0x128   : > { %v2058_v60 = vpop.f32.mrb[31].mxu1 }
 0x129   : > { %v848_v58 = vadd.f32 %v847_v32, %v1925_v51 }
 0x12b   : > { %v849_v45 = vadd.f32 %v848_v58, %v1934_v56 }
 0x12d   : > { %v850_v31 = vadd.f32 %v1921_v49, %v849_v45 }
 0x12f   : > { %v851_v12 = vadd.f32 %v1930_v54, %v850_v31 }
 0x131   : > { %v852_v30 = vadd.f32 %v851_v12, %v1945_v63 }
 0x133   : > { %v853_v32 = vadd.f32 %v852_v30, %v1954_v4 }
 0x135   : > { %v854_v51 = vadd.f32 %v1941_v61, %v853_v32 }
 0x137   : > { %v855_v58 = vadd.f32 %v1950_v2, %v854_v51 }
 0x139   : > { %v856_v45 = vadd.f32 %v855_v58, %v1965_v11 }
 0x13b   : > { %v857_v31 = vadd.f32 %v856_v45, %v1974_v16 }
 0x13d   : > { %v858_v54 = vadd.f32 %v1961_v9, %v857_v31 }
 0x13f   : > { %v859_v49 = vadd.f32 %v1970_v14, %v858_v54 }
 0x141   : > { %v860_v12 = vadd.f32 %v859_v49, %v1985_v23 }
 0x143   : > { %v861_v63 = vadd.f32 %v860_v12, %v1994_v28 }
 0x145   : > { %v862_v56 = vadd.f32 %v1981_v21, %v861_v63 }
 0x147   : > { %v863_v30 = vadd.f32 %v1990_v26, %v862_v56 }
 0x149   : > { %v864_v32 = vadd.f32 %v863_v30, %v2005_v40 }
 0x14b   : > { %v865_v51 = vadd.f32 %v864_v32, %v2014_v52 }
 0x14d   : > { %v866_v58 = vadd.f32 %v2001_v37, %v865_v51 }
 0x14f   : > { %v867_v45 = vadd.f32 %v2010_v46, %v866_v58 }
 0x151   : > { %v868_v31 = vadd.f32 %v867_v45, %v2025_v8 }
 0x153   : > { %v869_v54 = vadd.f32 %v868_v31, %v2034_v24 }
 0x155   : > { %v870_v49 = vadd.f32 %v2021_v5, %v869_v54 }
 0x157   : > { %v871_v12 = vadd.f32 %v2030_v18, %v870_v49 }
 0x159   : > { %v872_v63 = vadd.f32 %v871_v12, %v2041_v57 }
 0x15b   : > { %v873_v56 = vadd.f32 %v872_v63, %v2046_v6 }
 0x15d   : > { %v874_v30 = vadd.f32 %v2039_v42, %v873_v56 }
 0x15f   : > { %v875_v32 = vadd.f32 %v2044_v0, %v874_v30 }
 0x161   : > { %v876_v51 = vadd.f32 %v875_v32, %v2053_v29  ;;  %v3177_v32 = vld [vmem:[#allocation8_spill] sm:$0xff] }
 0x163   : > { %v877_v58 = vadd.f32 %v876_v51, %v2058_v60  ;;  %v3178_v51 = vld [vmem:[#allocation11_spill] sm:$0xff] }
 0x165   : > { %v878_v45 = vadd.f32 %v2051_v20, %v877_v58  ;;  %v3179_v58 = vld [vmem:[#allocation14_spill] sm:$0xff] }
 0x167   : > { %v879_v31 = vadd.f32 %v2056_v17, %v878_v45  ;;  %v3181_v45 = vld [vmem:[#allocation9_spill] sm:$0xff] }
 0x169   : > { %v880_v24 = vrot.slane %v879_v31, 4 }
 0x16b   : > { %v881_v54 = vadd.f32 %v880_v24, %v879_v31  ;;  %v3183_v31 = vld [vmem:[#allocation12_spill] sm:$0xff] }
 0x16d   : > { %v882_v5 = vrot.slane %v881_v54, 2 }
 0x16f   : > { %v883_v49 = vadd.f32 %v882_v5, %v881_v54 }
 0x171   : > { %v884_v18 = vrot.slane %v883_v49, 1 }
 0x173   : > { %v885_v12 = vadd.f32 %v884_v18, %v883_v49  ;;  %v3176_v18 = vld [vmem:[#allocation7_spill] sm:$0xff] }
 0x174   : > { %v3184_v49 = vld [vmem:[#allocation3_spill] sm:$0xff] }
 0x175   : > { %v2087_v57 = vmul.f32 0.001953125, %v885_v12 }
 0x177   : > { %v2091_v63 = vsub.f32 %v1897_v34, %v2087_v57  ;;  %v2095_v56 = vsub.f32 %v1901_v36, %v2087_v57  ;;  %v2099_v30 = vsub.f32 %v1895_v33, %v2087_v57  ;;  %v2103_v24 = vsub.f32 %v1899_v35, %v2087_v57 }
 0x178   : > { %v2107_v5 = vsub.f32 %v1909_v41, %v2087_v57  ;;  %v2111_v34 = vsub.f32 %v1914_v44, %v2087_v57  ;;  %v2115_v36 = vsub.f32 %v1906_v39, %v2087_v57  ;;  %v2119_v33 = vsub.f32 %v1912_v43, %v2087_v57 }
 0x179   : > { %3171 = vst [vmem:[#allocation17_spill] sm:$0xff] %v2091_v63  ;;  %3172 = vst [vmem:[#allocation18_spill] sm:$0xff] %v2095_v56  ;;  %v2123_v35 = vsub.f32 %v1923_v50, %v2087_v57  ;;  %v2127_v41 = vsub.f32 %v1932_v55, %v2087_v57  ;;  %v2131_v44 = vsub.f32 %v1918_v47, %v2087_v57 }
 0x17a   : > { %3173 = vst [vmem:[#allocation19_spill] sm:$0xff] %v2099_v30  ;;  %v2135_v39 = vsub.f32 %v1928_v53, %v2087_v57  ;;  %v2139_v43 = vsub.f32 %v1943_v62, %v2087_v57  ;;  %v2143_v50 = vsub.f32 %v1952_v3, %v2087_v57  ;;  %v2147_v55 = vsub.f32 %v1938_v59, %v2087_v57 }
 0x17b   : > { %v2151_v47 = vsub.f32 %v1948_v1, %v2087_v57  ;;  %v2155_v53 = vsub.f32 %v1963_v10, %v2087_v57  ;;  %v2159_v62 = vsub.f32 %v1972_v15, %v2087_v57  ;;  %v2163_v3 = vsub.f32 %v1958_v7, %v2087_v57 }
 0x17c   : > { %v2167_v59 = vsub.f32 %v1968_v13, %v2087_v57  ;;  %v2171_v1 = vsub.f32 %v1983_v22, %v2087_v57  ;;  %v2175_v10 = vsub.f32 %v1992_v27, %v2087_v57  ;;  %v2179_v15 = vsub.f32 %v1978_v19, %v2087_v57 }
 0x17d   : > { %v2183_v7 = vsub.f32 %v1988_v25, %v2087_v57  ;;  %v2187_v13 = vsub.f32 %v2003_v38, %v2087_v57  ;;  %v2191_v22 = vsub.f32 %v2012_v48, %v2087_v57  ;;  %v2195_v27 = vsub.f32 %v3176_v18, %v2087_v57  ;;  %v3185_v18 = vld [vmem:[#allocation5_spill] sm:$0xff] }
 0x17e   : > { %v2199_v19 = vsub.f32 %v3177_v32, %v2087_v57  ;;  %v2203_v25 = vsub.f32 %v3178_v51, %v2087_v57  ;;  %v2207_v38 = vsub.f32 %v3179_v58, %v2087_v57  ;;  %v2211_v48 = vsub.f32 %v3181_v45, %v2087_v57  ;;  %v3186_v51 = vld [vmem:[#allocation2_spill] sm:$0xff] }
 0x17f   : > { %3174 = vst [vmem:[#allocation20_spill] sm:$0xff] %v2187_v13  ;;  %3175 = vst [vmem:[#allocation21_spill] sm:$0xff] %v2191_v22  ;;  %v2215_v54 = vsub.f32 %v3183_v31, %v2087_v57  ;;  %v2219_v12 = vsub.f32 %v3184_v49, %v2087_v57  ;;  %v2223_v32 = vsub.f32 %v3185_v18, %v2087_v57 }
 0x180   : > { %3180 = vst [vmem:[#allocation7_spill] sm:$0xff] %v2207_v38  ;;  %3182 = vst [vmem:[#allocation8_spill] sm:$0xff] %v2211_v48  ;;  %v2227_v58 = vsub.f32 %v3186_v51, %v2087_v57  ;;  %v3187_v38 = vld [vmem:[#allocation4_spill] sm:$0xff]  ;;  %v3188_v48 = vld [vmem:[#allocation6_spill] sm:$0xff]  ;;  %v2239_v49 = vsub.f32 %v1954_v4, %v2087_v57  ;;  %v2243_v18 = vsub.f32 %v1941_v61, %v2087_v57 }
 0x181   : > { %v2231_v45 = vsub.f32 %v3187_v38, %v2087_v57  ;;  %v2235_v31 = vsub.f32 %v3188_v48, %v2087_v57  ;;  %v2247_v51 = vsub.f32 %v1950_v2, %v2087_v57  ;;  %v2251_v38 = vsub.f32 %v1965_v11, %v2087_v57 }
 0x182   : > { %v2255_v48 = vsub.f32 %v1974_v16, %v2087_v57  ;;  %v2259_v4 = vsub.f32 %v1961_v9, %v2087_v57  ;;  %v2263_v61 = vsub.f32 %v1970_v14, %v2087_v57  ;;  %v2267_v2 = vsub.f32 %v1985_v23, %v2087_v57 }
 0x183   : > { %v2271_v11 = vsub.f32 %v1994_v28, %v2087_v57  ;;  %v2275_v16 = vsub.f32 %v1981_v21, %v2087_v57  ;;  %v2279_v9 = vsub.f32 %v1990_v26, %v2087_v57  ;;  %v2283_v14 = vsub.f32 %v2005_v40, %v2087_v57 }
 0x184   : > { %3189 = vst [vmem:[#allocation11_spill] sm:$0xff] %v2259_v4  ;;  %3190 = vst [vmem:[#allocation14_spill] sm:$0xff] %v2263_v61  ;;  %v2287_v23 = vsub.f32 %v2014_v52, %v2087_v57  ;;  %v2291_v28 = vsub.f32 %v2001_v37, %v2087_v57  ;;  %v2295_v21 = vsub.f32 %v2010_v46, %v2087_v57 }
 0x185   : > { %3191 = vst [vmem:[#allocation9_spill] sm:$0xff] %v2267_v2  ;;  %3192 = vst [vmem:[#allocation12_spill] sm:$0xff] %v2271_v11  ;;  %v2299_v26 = vsub.f32 %v2025_v8, %v2087_v57  ;;  %v2319_v8 = vsub.f32 %v2046_v6, %v2087_v57  ;;  %v2339_v6 = vsub.f32 %v2051_v20, %v2087_v57 }
 0x186   : > { %3193 = vst [vmem:[#allocation3_spill] sm:$0xff] %v2279_v9  ;;  %3194 = vst [vmem:[#allocation5_spill] sm:$0xff] %v2283_v14  ;;  %v3197_v9 = vld [vmem:[#allocation15_spill] sm:$0xff]  ;;  %v3199_v14 = vld [vmem:[#allocation10_spill] sm:$0xff]  ;;  %v955_v20 = vmul.f32 %v2107_v5, %v2107_v5 }
 0x187   : > { %3195 = vst [vmem:[#allocation2_spill] sm:$0xff] %v2287_v23  ;;  %3196 = vst [vmem:[#allocation4_spill] sm:$0xff] %v2291_v28  ;;  %v2303_v40 = vsub.f32 %v3197_v9, %v2087_v57  ;;  %v2307_v52 = vsub.f32 %v3199_v14, %v2087_v57  ;;  %v3201_v23 = vld [vmem:[#allocation13_spill] sm:$0xff]  ;;  %v3203_v28 = vld [vmem:[#allocation16_spill] sm:$0xff]  ;;  %v2323_v9 = vsub.f32 %v2039_v42, %v2087_v57 }
 0x188   : > { %v2311_v37 = vsub.f32 %v3201_v23, %v2087_v57  ;;  %v2315_v46 = vsub.f32 %v3203_v28, %v2087_v57  ;;  %3205 = vst [vmem:[#allocation16_spill] sm:$0xff] %v2319_v8  ;;  %v2327_v14 = vsub.f32 %v2044_v0, %v2087_v57  ;;  %v2331_v23 = vsub.f32 %v2053_v29, %v2087_v57 }
 0x189   : > { %3198 = vst [vmem:[#allocation6_spill] sm:$0xff] %v2303_v40  ;;  %3200 = vst [vmem:[#allocation15_spill] sm:$0xff] %v2307_v52  ;;  %v2335_v28 = vsub.f32 %v2058_v60, %v2087_v57  ;;  %v2343_v42 = vsub.f32 %v2056_v17, %v2087_v57  ;;  %v951_v0 = vmul.f32 %v2091_v63, %v2091_v63 }
 0x18a   : > { %3202 = vst [vmem:[#allocation10_spill] sm:$0xff] %v2311_v37  ;;  %3204 = vst [vmem:[#allocation13_spill] sm:$0xff] %v2315_v46  ;;  %v953_v29 = vmul.f32 %v2099_v30, %v2099_v30  ;;  %v954_v60 = vmul.f32 %v2103_v24, %v2103_v24  ;;  %v956_v17 = vmul.f32 %v2111_v34, %v2111_v34 }
 0x18b   : > { %3206 = vst [vmem:[#allocation22_spill] sm:$0xff] %v2323_v9  ;;  %3207 = vst [vmem:[#allocation23_spill] sm:$0xff] %v2327_v14  ;;  %v952_v14 = vmul.f32 %v2095_v56, %v2095_v56  ;;  %v957_v63 = vmul.f32 %v2115_v36, %v2115_v36  ;;  %v958_v30 = vmul.f32 %v2119_v33, %v2119_v33 }
 0x18c   : > { %3208 = vst [vmem:[#allocation24_spill] sm:$0xff] %v2331_v23  ;;  %3209 = vst [vmem:[#allocation25_spill] sm:$0xff] %v2335_v28 }
 0x18d   : > { %3210 = vst [vmem:[#allocation26_spill] sm:$0xff] %v2339_v6  ;;  %3211 = vst [vmem:[#allocation27_spill] sm:$0xff] %v2343_v42  ;;  %v1015_v23 = vadd.f32 %v952_v14, %v951_v0  ;;  %v959_v0 = vmul.f32 %v2123_v35, %v2123_v35 }
 0x18f   : > { %v1016_v28 = vadd.f32 %v1015_v23, %v953_v29  ;;  %v960_v29 = vmul.f32 %v2127_v41, %v2127_v41 }
 0x191   : > { %v1017_v6 = vadd.f32 %v1016_v28, %v954_v60  ;;  %v961_v60 = vmul.f32 %v2131_v44, %v2131_v44 }
 0x193   : > { %v1018_v57 = vadd.f32 %v1017_v6, %v955_v20  ;;  %v962_v20 = vmul.f32 %v2135_v39, %v2135_v39 }
 0x195   : > { %v1019_v56 = vadd.f32 %v1018_v57, %v956_v17  ;;  %v963_v57 = vmul.f32 %v2139_v43, %v2139_v43 }
 0x197   : > { %v1020_v14 = vadd.f32 %v1019_v56, %v957_v63  ;;  %v964_v56 = vmul.f32 %v2143_v50, %v2143_v50 }
 0x199   : > { %v1021_v23 = vadd.f32 %v1020_v14, %v958_v30  ;;  %v965_v14 = vmul.f32 %v2147_v55, %v2147_v55 }
 0x19b   : > { %v1022_v28 = vadd.f32 %v1021_v23, %v959_v0  ;;  %v966_v23 = vmul.f32 %v2151_v47, %v2151_v47 }
 0x19d   : > { %v1023_v6 = vadd.f32 %v1022_v28, %v960_v29  ;;  %v967_v28 = vmul.f32 %v2155_v53, %v2155_v53 }
 0x19f   : > { %v1024_v17 = vadd.f32 %v1023_v6, %v961_v60  ;;  %v968_v6 = vmul.f32 %v2159_v62, %v2159_v62 }
 0x1a1   : > { %v1025_v63 = vadd.f32 %v1024_v17, %v962_v20  ;;  %v969_v17 = vmul.f32 %v2163_v3, %v2163_v3 }
 0x1a3   : > { %v1026_v30 = vadd.f32 %v1025_v63, %v963_v57  ;;  %v970_v63 = vmul.f32 %v2167_v59, %v2167_v59 }
 0x1a5   : > { %v1027_v0 = vadd.f32 %v1026_v30, %v964_v56  ;;  %v971_v30 = vmul.f32 %v2171_v1, %v2171_v1 }
 0x1a7   : > { %v1028_v29 = vadd.f32 %v1027_v0, %v965_v14  ;;  %v972_v0 = vmul.f32 %v2175_v10, %v2175_v10 }
 0x1a9   : > { %v1029_v60 = vadd.f32 %v1028_v29, %v966_v23  ;;  %v973_v29 = vmul.f32 %v2179_v15, %v2179_v15 }
 0x1ab   : > { %v1030_v20 = vadd.f32 %v1029_v60, %v967_v28  ;;  %v974_v60 = vmul.f32 %v2183_v7, %v2183_v7 }
 0x1ad   : > { %v1031_v57 = vadd.f32 %v1030_v20, %v968_v6  ;;  %v975_v20 = vmul.f32 %v2187_v13, %v2187_v13 }
 0x1af   : > { %v1032_v56 = vadd.f32 %v1031_v57, %v969_v17  ;;  %v976_v57 = vmul.f32 %v2191_v22, %v2191_v22 }
 0x1b1   : > { %v1033_v14 = vadd.f32 %v1032_v56, %v970_v63  ;;  %v977_v56 = vmul.f32 %v2195_v27, %v2195_v27 }
 0x1b3   : > { %v1034_v23 = vadd.f32 %v1033_v14, %v971_v30  ;;  %v978_v14 = vmul.f32 %v2199_v19, %v2199_v19 }
 0x1b5   : > { %v1035_v28 = vadd.f32 %v1034_v23, %v972_v0  ;;  %v979_v23 = vmul.f32 %v2203_v25, %v2203_v25 }
 0x1b7   : > { %v1036_v6 = vadd.f32 %v1035_v28, %v973_v29  ;;  %v3212_v28 = vld [vmem:[#allocation7_spill] sm:$0xff] }
 0x1b8   : > { %v980_v13 = vmul.f32 %v3212_v28, %v3212_v28 }
 0x1b9   : > { %v1037_v17 = vadd.f32 %v1036_v6, %v974_v60  ;;  %v3213_v6 = vld [vmem:[#allocation8_spill] sm:$0xff] }
 0x1ba   : > { %v981_v22 = vmul.f32 %v3213_v6, %v3213_v6 }
 0x1bb   : > { %v1038_v63 = vadd.f32 %v1037_v17, %v975_v20  ;;  %v982_v17 = vmul.f32 %v2215_v54, %v2215_v54 }
 0x1bd   : > { %v1039_v30 = vadd.f32 %v1038_v63, %v976_v57  ;;  %v983_v63 = vmul.f32 %v2219_v12, %v2219_v12 }
 0x1bf   : > { %v1040_v0 = vadd.f32 %v1039_v30, %v977_v56  ;;  %v984_v30 = vmul.f32 %v2223_v32, %v2223_v32 }
 0x1c1   : > { %v1041_v29 = vadd.f32 %v1040_v0, %v978_v14  ;;  %v985_v0 = vmul.f32 %v2227_v58, %v2227_v58 }
 0x1c3   : > { %v1042_v60 = vadd.f32 %v1041_v29, %v979_v23  ;;  %v986_v29 = vmul.f32 %v2231_v45, %v2231_v45 }
 0x1c5   : > { %v1043_v20 = vadd.f32 %v1042_v60, %v980_v13  ;;  %v987_v60 = vmul.f32 %v2235_v31, %v2235_v31 }
 0x1c7   : > { %v1044_v57 = vadd.f32 %v1043_v20, %v981_v22  ;;  %v988_v20 = vmul.f32 %v2239_v49, %v2239_v49 }
 0x1c9   : > { %v1045_v56 = vadd.f32 %v1044_v57, %v982_v17  ;;  %v989_v57 = vmul.f32 %v2243_v18, %v2243_v18 }
 0x1cb   : > { %v1046_v14 = vadd.f32 %v1045_v56, %v983_v63  ;;  %v990_v56 = vmul.f32 %v2247_v51, %v2247_v51 }
 0x1cd   : > { %v1047_v23 = vadd.f32 %v1046_v14, %v984_v30  ;;  %v991_v14 = vmul.f32 %v2251_v38, %v2251_v38 }
 0x1cf   : > { %v1048_v13 = vadd.f32 %v1047_v23, %v985_v0  ;;  %v992_v23 = vmul.f32 %v2255_v48, %v2255_v48 }
 0x1d1   : > { %v1049_v22 = vadd.f32 %v1048_v13, %v986_v29  ;;  %v993_v13 = vmul.f32 %v2259_v4, %v2259_v4 }
 0x1d3   : > { %v1050_v17 = vadd.f32 %v1049_v22, %v987_v60  ;;  %v994_v22 = vmul.f32 %v2263_v61, %v2263_v61 }
 0x1d5   : > { %v1051_v63 = vadd.f32 %v1050_v17, %v988_v20  ;;  %v995_v17 = vmul.f32 %v2267_v2, %v2267_v2 }
 0x1d7   : > { %v1052_v30 = vadd.f32 %v1051_v63, %v989_v57  ;;  %v996_v63 = vmul.f32 %v2271_v11, %v2271_v11 }
 0x1d9   : > { %v1053_v0 = vadd.f32 %v1052_v30, %v990_v56  ;;  %v997_v30 = vmul.f32 %v2275_v16, %v2275_v16 }
 0x1db   : > { %v1054_v29 = vadd.f32 %v1053_v0, %v991_v14  ;;  %v3214_v0 = vld [vmem:[#allocation3_spill] sm:$0xff] }
 0x1dc   : > { %v998_v4 = vmul.f32 %v3214_v0, %v3214_v0 }
 0x1dd   : > { %v1055_v60 = vadd.f32 %v1054_v29, %v992_v23  ;;  %v3215_v29 = vld [vmem:[#allocation5_spill] sm:$0xff] }
 0x1de   : > { %v999_v61 = vmul.f32 %v3215_v29, %v3215_v29 }
 0x1df   : > { %v1056_v20 = vadd.f32 %v1055_v60, %v993_v13  ;;  %v3216_v60 = vld [vmem:[#allocation2_spill] sm:$0xff] }
 0x1e0   : > { %v1000_v2 = vmul.f32 %v3216_v60, %v3216_v60 }
 0x1e1   : > { %v1057_v57 = vadd.f32 %v1056_v20, %v994_v22  ;;  %v3217_v20 = vld [vmem:[#allocation4_spill] sm:$0xff] }
 0x1e2   : > { %v1001_v11 = vmul.f32 %v3217_v20, %v3217_v20 }
 0x1e3   : > { %v1058_v56 = vadd.f32 %v1057_v57, %v995_v17  ;;  %v1002_v57 = vmul.f32 %v2295_v21, %v2295_v21 }
 0x1e5   : > { %v1059_v14 = vadd.f32 %v1058_v56, %v996_v63  ;;  %v1003_v56 = vmul.f32 %v2299_v26, %v2299_v26 }
 0x1e7   : > { %v1060_v23 = vadd.f32 %v1059_v14, %v997_v30  ;;  %v1004_v14 = vmul.f32 %v2303_v40, %v2303_v40 }
 0x1e9   : > { %v1061_v13 = vadd.f32 %v1060_v23, %v998_v4  ;;  %v1005_v23 = vmul.f32 %v2307_v52, %v2307_v52 }
 0x1eb   : > { %v1062_v22 = vadd.f32 %v1061_v13, %v999_v61  ;;  %v1006_v13 = vmul.f32 %v2311_v37, %v2311_v37 }
 0x1ed   : > { %v1063_v17 = vadd.f32 %v1062_v22, %v1000_v2  ;;  %v1007_v22 = vmul.f32 %v2315_v46, %v2315_v46 }
 0x1ef   : > { %v1064_v63 = vadd.f32 %v1063_v17, %v1001_v11  ;;  %v1008_v17 = vmul.f32 %v2319_v8, %v2319_v8 }
 0x1f1   : > { %v1065_v30 = vadd.f32 %v1064_v63, %v1002_v57  ;;  %v1009_v63 = vmul.f32 %v2323_v9, %v2323_v9 }
 0x1f3   : > { %v1066_v4 = vadd.f32 %v1065_v30, %v1003_v56  ;;  %v3218_v30 = vld [vmem:[#allocation23_spill] sm:$0xff] }
 0x1f4   : > { %v1010_v52 = vmul.f32 %v3218_v30, %v3218_v30 }
 0x1f5   : > { %v1067_v61 = vadd.f32 %v1066_v4, %v1004_v14  ;;  %v3219_v4 = vld [vmem:[#allocation24_spill] sm:$0xff] }
 0x1f6   : > { %v1011_v37 = vmul.f32 %v3219_v4, %v3219_v4 }
 0x1f7   : > { %v1068_v2 = vadd.f32 %v1067_v61, %v1005_v23  ;;  %v3220_v61 = vld [vmem:[#allocation25_spill] sm:$0xff] }
 0x1f8   : > { %v1012_v46 = vmul.f32 %v3220_v61, %v3220_v61  ;;  %v1090_v61 = vlaneseq }
 0x1f9   : > { %v1069_v11 = vadd.f32 %v1068_v2, %v1006_v13  ;;  %v3221_v2 = vld [vmem:[#allocation26_spill] sm:$0xff] }
 0x1fa   : > { %v1013_v8 = vmul.f32 %v3221_v2, %v3221_v2 }
 0x1fb   : > { %v1070_v57 = vadd.f32 %v1069_v11, %v1007_v22  ;;  %v1014_v11 = vmul.f32 %v2343_v42, %v2343_v42 }
 0x1fd   : > { %v1071_v56 = vadd.f32 %v1070_v57, %v1008_v17 }
 0x1ff   : > { %v1072_v14 = vadd.f32 %v1071_v56, %v1009_v63 }
 0x201   : > { %v1073_v23 = vadd.f32 %v1072_v14, %v1010_v52 }
 0x203   : > { %v1074_v13 = vadd.f32 %v1073_v23, %v1011_v37  ;;  %v1091_v37 = vshrl.u32 %v1090_v61, 7 }
 0x205   : > { %v1075_v22 = vadd.f32 %v1074_v13, %v1012_v46  ;;  %v1085_v46 = vld [vmem:[%s3100_s2] sm:$0x1]  ;;  %v1092_v23 = vsub.s32 0, %v1091_v37 }
 0x207   : > { %v1076_v17 = vadd.f32 %v1075_v22, %v1013_v8  ;;  %v3222_v22 = vld [vmem:[#allocation17_spill] sm:$0xff] }
 0x209   : > { %v1077_v57 = vadd.f32 %v1076_v17, %v1014_v11 }
 0x20b   : > { %v1078_v9 = vrot.slane %v1077_v57, 4 }
 0x20d   : > { %v1079_v30 = vadd.f32 %v1078_v9, %v1077_v57 }
 0x20f   : > { %v1080_v63 = vrot.slane %v1079_v30, 2 }
 0x211   : > { %v1081_v56 = vadd.f32 %v1080_v63, %v1079_v30  ;;  %v3223_v30 = vld [vmem:[#allocation18_spill] sm:$0xff] }
 0x213   : > { %v1082_v40 = vrot.slane %v1081_v56, 1 }
 0x215   : > { %v1083_v4 = vadd.f32 %v1082_v40, %v1081_v56  ;;  %v3225_v56 = vld [vmem:[#allocation20_spill] sm:$0xff] }
 0x217   : > { %v1084_v52 = vmul.f32 0.001953125, %v1083_v4  ;;  %v3224_v4 = vld [vmem:[#allocation19_spill] sm:$0xff] }
 0x219   : > { %v1086_v14 = vadd.f32 1e-05, %v1084_v52  ;;  %v3226_v52 = vld [vmem:[#allocation21_spill] sm:$0xff] }
 0x21b   : > { %1777 = vrsqrt.f32 %v1086_v14 }
 0x225   : > { %v1778_v13 = vpop.eup %1777 }
 0x226   : > { %v1088_v42 = vmul.f32 %v1778_v13, %v1085_v46  ;;  %v3227_v46 = vld [vmem:[#allocation11_spill] sm:$0xff]  ;;  %v3229_v13 = vld [vmem:[#allocation9_spill] sm:$0xff] }
 0x228   : > { %v2476_v8 = vrot.slane %v1088_v42, %v1092_v23  ;;  %v3228_v23 = vld [vmem:[#allocation14_spill] sm:$0xff] }
 0x22a   : > { %v2480_v9 = vmul.f32 %v2476_v8, %v3222_v22  ;;  %v2484_v40 = vmul.f32 %v2476_v8, %v3223_v30  ;;  %v2488_v61 = vmul.f32 %v2476_v8, %v3224_v4  ;;  %v2492_v11 = vmul.f32 %v2476_v8, %v2103_v24  ;;  %v3230_v22 = vld [vmem:[#allocation12_spill] sm:$0xff] }
 0x22b   : > { %v2496_v42 = vmul.f32 %v2476_v8, %v2107_v5  ;;  %v2500_v17 = vmul.f32 %v2476_v8, %v2111_v34  ;;  %v2504_v57 = vmul.f32 %v2476_v8, %v2115_v36  ;;  %v2508_v63 = vmul.f32 %v2476_v8, %v2119_v33 }
 0x22c   : > { %v2512_v24 = vmul.f32 %v2476_v8, %v2123_v35  ;;  %v2516_v5 = vmul.f32 %v2476_v8, %v2127_v41  ;;  %v2520_v34 = vmul.f32 %v2476_v8, %v2131_v44  ;;  %v2524_v36 = vmul.f32 %v2476_v8, %v2135_v39 }
 0x22d   : > { %v2528_v33 = vmul.f32 %v2476_v8, %v2139_v43  ;;  %v2532_v35 = vmul.f32 %v2476_v8, %v2143_v50  ;;  %v2536_v41 = vmul.f32 %v2476_v8, %v2147_v55  ;;  %v2540_v44 = vmul.f32 %v2476_v8, %v2151_v47 }
 0x22e   : > { %v2544_v39 = vmul.f32 %v2476_v8, %v2155_v53  ;;  %v2548_v43 = vmul.f32 %v2476_v8, %v2159_v62  ;;  %v2552_v50 = vmul.f32 %v2476_v8, %v2163_v3  ;;  %v2556_v55 = vmul.f32 %v2476_v8, %v2167_v59 }
 0x22f   : > { %v2560_v47 = vmul.f32 %v2476_v8, %v2171_v1  ;;  %v2564_v53 = vmul.f32 %v2476_v8, %v2175_v10  ;;  %v2568_v62 = vmul.f32 %v2476_v8, %v2179_v15  ;;  %v2572_v3 = vmul.f32 %v2476_v8, %v2183_v7 }
 0x230   : > { %v2576_v59 = vmul.f32 %v2476_v8, %v3225_v56  ;;  %v2580_v1 = vmul.f32 %v2476_v8, %v3226_v52  ;;  %v2584_v10 = vmul.f32 %v2476_v8, %v2195_v27  ;;  %v2588_v15 = vmul.f32 %v2476_v8, %v2199_v19 }
 0x231   : > { %v2592_v7 = vmul.f32 %v2476_v8, %v2203_v25  ;;  %v2596_v14 = vmul.f32 %v2476_v8, %v3212_v28  ;;  %v2600_v37 = vmul.f32 %v2476_v8, %v3213_v6  ;;  %v2604_v27 = vmul.f32 %v2476_v8, %v2215_v54 }
 0x232   : > { %v2608_v19 = vmul.f32 %v2476_v8, %v2219_v12  ;;  %v2612_v25 = vmul.f32 %v2476_v8, %v2223_v32  ;;  %v2616_v28 = vmul.f32 %v2476_v8, %v2227_v58  ;;  %v2620_v6 = vmul.f32 %v2476_v8, %v2231_v45 }
 0x233   : > { %v2624_v54 = vmul.f32 %v2476_v8, %v2235_v31  ;;  %v2628_v12 = vmul.f32 %v2476_v8, %v2239_v49  ;;  %v2632_v32 = vmul.f32 %v2476_v8, %v2243_v18  ;;  %v2636_v58 = vmul.f32 %v2476_v8, %v2247_v51 }
 0x234   : > { %v2640_v45 = vmul.f32 %v2476_v8, %v2251_v38  ;;  %v2644_v31 = vmul.f32 %v2476_v8, %v2255_v48  ;;  %v2648_v49 = vmul.f32 %v2476_v8, %v3227_v46  ;;  %v2652_v18 = vmul.f32 %v2476_v8, %v3228_v23  ;;  %v3234_v46 = vld [vmem:[#allocation6_spill] sm:$0xff]  ;;  %v3236_v23 = vld [vmem:[#allocation15_spill] sm:$0xff] }
 0x235   : > { %v2656_v51 = vmul.f32 %v2476_v8, %v3229_v13  ;;  %v2660_v38 = vmul.f32 %v2476_v8, %v3230_v22  ;;  %v2664_v48 = vmul.f32 %v2476_v8, %v2275_v16  ;;  %v2668_v30 = vmul.f32 %v2476_v8, %v3214_v0  ;;  %v3238_v13 = vld [vmem:[#allocation10_spill] sm:$0xff]  ;;  %v3240_v22 = vld [vmem:[#allocation13_spill] sm:$0xff] }
 0x236   : > { %v2672_v4 = vmul.f32 %v2476_v8, %v3215_v29  ;;  %v2676_v56 = vmul.f32 %v2476_v8, %v3216_v60  ;;  %v2680_v52 = vmul.f32 %v2476_v8, %v3217_v20  ;;  %v2684_v16 = vmul.f32 %v2476_v8, %v2295_v21  ;;  %v2705_v21 = vld [vmem:[%s3101_s3] ss:$0 sm:$0xff] }
 0x237   : > { %v2688_v0 = vmul.f32 %v2476_v8, %v2299_v26  ;;  %v2692_v29 = vmul.f32 %v2476_v8, %v3234_v46  ;;  %v2696_v60 = vmul.f32 %v2476_v8, %v3236_v23  ;;  %v2700_v20 = vmul.f32 %v2476_v8, %v3238_v13 }
 0x238   : > { %3231 = vst [vmem:[#allocation7_spill] sm:$0xff] %v2680_v52  ;;  %3232 = vst [vmem:[#allocation8_spill] sm:$0xff] %v2684_v16  ;;  %v2709_v26 = vmul.f32 %v2476_v8, %v3240_v22  ;;  %v3246_v52 = vld [vmem:[#allocation25_spill] sm:$0xff] }
 0x239   : > { %3233 = vst [vmem:[#allocation3_spill] sm:$0xff] %v2688_v0  ;;  %3235 = vst [vmem:[#allocation5_spill] sm:$0xff] %v2692_v29  ;;  %v3241_v0 = vld [vmem:[#allocation16_spill] sm:$0xff]  ;;  %v3243_v29 = vld [vmem:[#allocation22_spill] sm:$0xff]  ;;  %v2729_v22 = vmul.f32 %v2476_v8, %v3246_v52  ;;  %v2749_v52 = vadd.f32 %v2705_v21, %v2488_v61  ;;  %v2769_v61 = vadd.f32 %v2705_v21, %v2508_v63 }
 0x23a   : > { %3237 = vst [vmem:[#allocation2_spill] sm:$0xff] %v2696_v60  ;;  %3239 = vst [vmem:[#allocation4_spill] sm:$0xff] %v2700_v20  ;;  %v2713_v46 = vmul.f32 %v2476_v8, %v3241_v0  ;;  %v2717_v23 = vmul.f32 %v2476_v8, %v3243_v29  ;;  %v3244_v60 = vld [vmem:[#allocation23_spill] sm:$0xff]  ;;  %v3245_v20 = vld [vmem:[#allocation24_spill] sm:$0xff]  ;;  %v2733_v0 = vmul.f32 %v2476_v8, %v3221_v2 }
 0x23b   : > { %v2721_v13 = vmul.f32 %v2476_v8, %v3244_v60  ;;  %v2725_v16 = vmul.f32 %v2476_v8, %v3245_v20  ;;  %v2741_v60 = vadd.f32 %v2705_v21, %v2480_v9  ;;  %v2745_v20 = vadd.f32 %v2705_v21, %v2484_v40  ;;  %3251 = vst [vmem:[#allocation20_spill] sm:$0xff] %v2769_v61 }
 0x23c   : > { %3242 = vst [vmem:[#allocation26_spill] sm:$0xff] %v2713_v46  ;;  %v3247_v46 = vld [vmem:[#allocation27_spill] sm:$0xff]  ;;  %v2753_v2 = vadd.f32 %v2705_v21, %v2492_v11  ;;  %v2761_v9 = vadd.f32 %v2705_v21, %v2500_v17  ;;  %v2765_v40 = vadd.f32 %v2705_v21, %v2504_v57  ;;  %v2773_v11 = vadd.f32 %v2705_v21, %v2512_v24 }
 0x23d   : > { %v2737_v29 = vmul.f32 %v2476_v8, %v3247_v46  ;;  %v2757_v8 = vadd.f32 %v2705_v21, %v2496_v42  ;;  %v2777_v42 = vadd.f32 %v2705_v21, %v2516_v5  ;;  %v2781_v17 = vadd.f32 %v2705_v21, %v2520_v34 }
 0x23e   : > { %3249 = vst [vmem:[#allocation18_spill] sm:$0xff] %v2761_v9  ;;  %3250 = vst [vmem:[#allocation19_spill] sm:$0xff] %v2765_v40  ;;  %v2785_v57 = vadd.f32 %v2705_v21, %v2524_v36  ;;  %v2789_v63 = vadd.f32 %v2705_v21, %v2528_v33  ;;  %v2793_v24 = vadd.f32 %v2705_v21, %v2532_v35 }
 0x23f   : > { %3248 = vst [vmem:[#allocation17_spill] sm:$0xff] %v2757_v8  ;;  %3252 = vst [vmem:[#allocation21_spill] sm:$0xff] %v2773_v11  ;;  %v2797_v5 = vadd.f32 %v2705_v21, %v2536_v41  ;;  %v2801_v34 = vadd.f32 %v2705_v21, %v2540_v44  ;;  %v2805_v36 = vadd.f32 %v2705_v21, %v2544_v39  ;;  %v3265_v46 = vld [vmem:[#allocation7_spill] sm:$0xff] }
 0x240   : > { %3253 = vst [vmem:[#allocation11_spill] sm:$0xff] %v2777_v42  ;;  %3254 = vst [vmem:[#allocation14_spill] sm:$0xff] %v2781_v17  ;;  %v2809_v33 = vadd.f32 %v2705_v21, %v2548_v43  ;;  %v2813_v35 = vadd.f32 %v2705_v21, %v2552_v50  ;;  %v2817_v41 = vadd.f32 %v2705_v21, %v2556_v55 }
 0x241   : > { %3255 = vst [vmem:[#allocation9_spill] sm:$0xff] %v2785_v57  ;;  %3256 = vst [vmem:[#allocation12_spill] sm:$0xff] %v2789_v63  ;;  %v2821_v44 = vadd.f32 %v2705_v21, %v2560_v47  ;;  %v2825_v39 = vadd.f32 %v2705_v21, %v2564_v53  ;;  %v2829_v43 = vadd.f32 %v2705_v21, %v2568_v62 }
 0x242   : > { %3257 = vst [vmem:[#allocation6_spill] sm:$0xff] %v2793_v24  ;;  %3258 = vst [vmem:[#allocation15_spill] sm:$0xff] %v2797_v5  ;;  %v2833_v50 = vadd.f32 %v2705_v21, %v2572_v3  ;;  %v2837_v55 = vadd.f32 %v2705_v21, %v2576_v59  ;;  %v2841_v47 = vadd.f32 %v2705_v21, %v2580_v1 }
 0x243   : > { %3259 = vst [vmem:[#allocation10_spill] sm:$0xff] %v2801_v34  ;;  %v2845_v53 = vadd.f32 %v2705_v21, %v2584_v10  ;;  %v2849_v62 = vadd.f32 %v2705_v21, %v2588_v15  ;;  %v2853_v3 = vadd.f32 %v2705_v21, %v2592_v7  ;;  %v2857_v59 = vadd.f32 %v2705_v21, %v2596_v14 }
 0x244   : > { %v2861_v1 = vadd.f32 %v2705_v21, %v2600_v37  ;;  %v2865_v10 = vadd.f32 %v2705_v21, %v2604_v27  ;;  %v2869_v15 = vadd.f32 %v2705_v21, %v2608_v19  ;;  %v2873_v7 = vadd.f32 %v2705_v21, %v2612_v25 }
 0x245   : > { %v2877_v14 = vadd.f32 %v2705_v21, %v2616_v28  ;;  %v2881_v37 = vadd.f32 %v2705_v21, %v2620_v6  ;;  %v2885_v27 = vadd.f32 %v2705_v21, %v2624_v54  ;;  %v2889_v19 = vadd.f32 %v2705_v21, %v2628_v12 }
 0x246   : > { %v2893_v25 = vadd.f32 %v2705_v21, %v2632_v32  ;;  %v2897_v28 = vadd.f32 %v2705_v21, %v2636_v58  ;;  %v2901_v6 = vadd.f32 %v2705_v21, %v2640_v45  ;;  %v2905_v54 = vadd.f32 %v2705_v21, %v2644_v31 }
 0x247   : > { %v2909_v12 = vadd.f32 %v2705_v21, %v2648_v49  ;;  %v2913_v32 = vadd.f32 %v2705_v21, %v2652_v18  ;;  %v2917_v58 = vadd.f32 %v2705_v21, %v2656_v51  ;;  %v2921_v45 = vadd.f32 %v2705_v21, %v2660_v38 }
 0x248   : > { %v2925_v31 = vadd.f32 %v2705_v21, %v2664_v48  ;;  %v2929_v49 = vadd.f32 %v2705_v21, %v2668_v30  ;;  %v2933_v18 = vadd.f32 %v2705_v21, %v2672_v4  ;;  %v2937_v51 = vadd.f32 %v2705_v21, %v2676_v56 }
 0x249   : > { %3260 = vst [vmem:[#allocation13_spill] sm:$0xff] %v2921_v45  ;;  %v2941_v38 = vadd.f32 %v2705_v21, %v3265_v46  ;;  %v3266_v45 = vld [vmem:[#allocation8_spill] sm:$0xff] }
 0x24a   : > { %3261 = vst [vmem:[#allocation16_spill] sm:$0xff] %v2925_v31  ;;  %3262 = vst [vmem:[#allocation22_spill] sm:$0xff] %v2929_v49  ;;  %v2945_v48 = vadd.f32 %v2705_v21, %v3266_v45  ;;  %v3268_v31 = vld [vmem:[#allocation3_spill] sm:$0xff]  ;;  %v3269_v49 = vld [vmem:[#allocation5_spill] sm:$0xff]  ;;  %v2965_v45 = vadd.f32 %v2705_v21, %v2709_v26  ;;  %v2985_v26 = vadd.f32 %v2705_v21, %v2729_v22  ;;  %v1255_v22 = vmax.f32 %v2841_v47, 0.0 }
 0x24b   : > { %3263 = vst [vmem:[#allocation23_spill] sm:$0xff] %v2933_v18  ;;  %3264 = vst [vmem:[#allocation24_spill] sm:$0xff] %v2937_v51  ;;  %v2949_v30 = vadd.f32 %v2705_v21, %v3268_v31  ;;  %v2953_v4 = vadd.f32 %v2705_v21, %v3269_v49  ;;  %v3270_v18 = vld [vmem:[#allocation2_spill] sm:$0xff]  ;;  %v3271_v51 = vld [vmem:[#allocation4_spill] sm:$0xff]  ;;  %v2973_v49 = vadd.f32 %v2705_v21, %v2717_v23  ;;  %v1265_v47 = vmax.f32 %v2881_v37, 0.0 }
 0x24c   : > { %3267 = vst [vmem:[#allocation25_spill] sm:$0xff] %v2945_v48  ;;  %v2957_v56 = vadd.f32 %v2705_v21, %v3270_v18  ;;  %v2961_v46 = vadd.f32 %v2705_v21, %v3271_v51  ;;  %v3272_v48 = vld [vmem:[#allocation26_spill] sm:$0xff]  ;;  %v2977_v18 = vadd.f32 %v2705_v21, %v2721_v13  ;;  %v2981_v51 = vadd.f32 %v2705_v21, %v2725_v16 }
 0x24d   : > { %v2969_v31 = vadd.f32 %v2705_v21, %v3272_v48  ;;  %3273 = vst [vmem:[#allocation27_spill] sm:$0xff] %v2973_v49  ;;  %3276 = vst [vmem:[#allocation3_spill] sm:$0xff] %v2985_v26  ;;  %v2989_v48 = vadd.f32 %v2705_v21, %v2733_v0  ;;  %v2993_v23 = vadd.f32 %v2705_v21, %v2737_v29  ;;  %v1246_v26 = vmax.f32 %v2805_v36, 0.0 }
 0x24e   : > { %3274 = vst [vmem:[#allocation7_spill] sm:$0xff] %v2977_v18  ;;  %3275 = vst [vmem:[#allocation8_spill] sm:$0xff] %v2981_v51  ;;  %v1247_v0 = vmax.f32 %v2809_v33, 0.0  ;;  %v1249_v21 = vmax.f32 %v2817_v41, 0.0  ;;  %v1250_v29 = vmax.f32 %v2821_v44, 0.0  ;;  %v1251_v13 = vmax.f32 %v2825_v39, 0.0 }
 0x24f   : > { %3277 = vst [vmem:[#allocation5_spill] sm:$0xff] %v2989_v48  ;;  %v1248_v48 = vmax.f32 %v2813_v35, 0.0  ;;  %v1252_v18 = vmax.f32 %v2829_v43, 0.0  ;;  %v1253_v16 = vmax.f32 %v2833_v50, 0.0  ;;  %v1254_v51 = vmax.f32 %v2837_v55, 0.0 }
 0x250   : > { %v1256_v36 = vmax.f32 %v2845_v53, 0.0  ;;  %v1257_v33 = vmax.f32 %v2849_v62, 0.0  ;;  %v1258_v35 = vmax.f32 %v2853_v3, 0.0  ;;  %v1259_v41 = vmax.f32 %v2857_v59, 0.0  ;;  %v3278_v49 = vld [vmem:[#allocation13_spill] sm:$0xff] }
 0x251   : > { %v1260_v44 = vmax.f32 %v2861_v1, 0.0  ;;  %v1261_v39 = vmax.f32 %v2865_v10, 0.0  ;;  %v1262_v43 = vmax.f32 %v2869_v15, 0.0  ;;  %v1263_v50 = vmax.f32 %v2873_v7, 0.0  ;;  %v3279_v34 = vld [vmem:[#allocation16_spill] sm:$0xff]  ;;  %v3280_v5 = vld [vmem:[#allocation22_spill] sm:$0xff] }
 0x252   : > { %v1264_v55 = vmax.f32 %v2877_v14, 0.0  ;;  %v1266_v53 = vmax.f32 %v2885_v27, 0.0  ;;  %v1267_v62 = vmax.f32 %v2889_v19, 0.0  ;;  %v1268_v3 = vmax.f32 %v2893_v25, 0.0  ;;  %v3281_v24 = vld [vmem:[#allocation23_spill] sm:$0xff]  ;;  %v3282_v63 = vld [vmem:[#allocation24_spill] sm:$0xff] }
 0x253   : > { %v1269_v59 = vmax.f32 %v2897_v28, 0.0  ;;  %v1270_v1 = vmax.f32 %v2901_v6, 0.0  ;;  %v1271_v10 = vmax.f32 %v2905_v54, 0.0  ;;  %v1272_v15 = vmax.f32 %v2909_v12, 0.0  ;;  %v3283_v57 = vld [vmem:[#allocation25_spill] sm:$0xff] }
 0x254   : > { %v1273_v7 = vmax.f32 %v2913_v32, 0.0  ;;  %v1274_v14 = vmax.f32 %v2917_v58, 0.0  ;;  %v1275_v37 = vmax.f32 %v3278_v49, 0.0  ;;  %v1276_v27 = vmax.f32 %v3279_v34, 0.0  ;;  %v3284_v17 = vld [vmem:[#allocation27_spill] sm:$0xff] }
 0x255   : > { %v1277_v19 = vmax.f32 %v3280_v5, 0.0  ;;  %v1278_v25 = vmax.f32 %v3281_v24, 0.0  ;;  %v1279_v28 = vmax.f32 %v3282_v63, 0.0  ;;  %v1280_v6 = vmax.f32 %v2941_v38, 0.0  ;;  %v3285_v42 = vld [vmem:[#allocation7_spill] sm:$0xff]  ;;  %v3286_v11 = vld [vmem:[#allocation8_spill] sm:$0xff] }
 0x256   : > { %v1281_v54 = vmax.f32 %v3283_v57, 0.0  ;;  %v1282_v12 = vmax.f32 %v2949_v30, 0.0  ;;  %v1283_v32 = vmax.f32 %v2953_v4, 0.0  ;;  %v1284_v58 = vmax.f32 %v2957_v56, 0.0  ;;  %v3287_v61 = vld [vmem:[#allocation3_spill] sm:$0xff]  ;;  %v3288_v40 = vld [vmem:[#allocation5_spill] sm:$0xff] }
 0x257   : > { %v1285_v49 = vmax.f32 %v2961_v46, 0.0  ;;  %v1286_v34 = vmax.f32 %v2965_v45, 0.0  ;;  %v1287_v5 = vmax.f32 %v2969_v31, 0.0  ;;  %v1288_v24 = vmax.f32 %v3284_v17, 0.0 }
 0x258   : > { %v1289_v63 = vmax.f32 %v3285_v42, 0.0  ;;  %v1290_v38 = vmax.f32 %v3286_v11, 0.0  ;;  %v1291_v57 = vmax.f32 %v3287_v61, 0.0  ;;  %v1292_v30 = vmax.f32 %v3288_v40, 0.0  ;;  %v3293_v11 = vld [vmem:[#allocation17_spill] sm:$0xff] }
 0x259   : > { %v1293_v4 = vmax.f32 %v2993_v23, 0.0  ;;  %v3289_v56 = vmax.f32 %v2741_v60, 0.0  ;;  %v3290_v46 = vmax.f32 %v2745_v20, 0.0  ;;  %v3291_v31 = vmax.f32 %v2749_v52, 0.0  ;;  %v3295_v23 = vld [vmem:[#allocation18_spill] sm:$0xff] }
 0x25a   : > { %v3292_v17 = vmax.f32 %v2753_v2, 0.0  ;;  %v3294_v61 = vmax.f32 %v3293_v11, 0.0  ;;  %v3296_v60 = vmax.f32 %v3295_v23, 0.0 }
 0x25b   : > { %v1294_v9 = vmax.f32 %v3289_v56, %v1246_v26  ;;  %v1295_v45 = vmax.f32 %v3290_v46, %v1247_v0  ;;  %v1296_v8 = vmax.f32 %v3291_v31, %v1248_v48  ;;  %v3297_v56 = vld [vmem:[#allocation19_spill] sm:$0xff]  ;;  %v3299_v46 = vld [vmem:[#allocation20_spill] sm:$0xff]  ;;  %v3301_v48 = vld [vmem:[#allocation21_spill] sm:$0xff] }
 0x25c   : > { %v1297_v42 = vmax.f32 %v3292_v17, %v1249_v21  ;;  %v1298_v40 = vmax.f32 %v3294_v61, %v1250_v29  ;;  %v1299_v26 = vmax.f32 %v3296_v60, %v1251_v13  ;;  %v3298_v20 = vmax.f32 %v3297_v56, 0.0  ;;  %v3303_v21 = vld [vmem:[#allocation11_spill] sm:$0xff]  ;;  %v3305_v61 = vld [vmem:[#allocation14_spill] sm:$0xff]  ;;  %v3307_v60 = vld [vmem:[#allocation9_spill] sm:$0xff] }
 0x25d   : > { %v3300_v52 = vmax.f32 %v3299_v46, 0.0  ;;  %v3302_v2 = vmax.f32 %v3301_v48, 0.0  ;;  %v3304_v11 = vmax.f32 %v3303_v21, 0.0  ;;  %v3306_v23 = vmax.f32 %v3305_v61, 0.0 }
 0x25e   : > { %v1300_v0 = vmax.f32 %v3298_v20, %v1252_v18  ;;  %v3308_v56 = vmax.f32 %v3307_v60, 0.0  ;;  %v3309_v20 = vld [vmem:[#allocation12_spill] sm:$0xff]  ;;  %v1311_v60 = vmax.f32 %v1263_v50, %v1279_v28 }
 0x25f   : > { %v1301_v31 = vmax.f32 %v3300_v52, %v1253_v16  ;;  %v1302_v17 = vmax.f32 %v3302_v2, %v1254_v51  ;;  %v1303_v29 = vmax.f32 %v3304_v11, %v1255_v22  ;;  %v1304_v13 = vmax.f32 %v3306_v23, %v1256_v36  ;;  %v3311_v52 = vld [vmem:[#allocation6_spill] sm:$0xff]  ;;  %v3313_v51 = vld [vmem:[#allocation15_spill] sm:$0xff] }
 0x260   : > { %v1305_v18 = vmax.f32 %v3308_v56, %v1257_v33  ;;  %v3310_v46 = vmax.f32 %v3309_v20, 0.0  ;;  %v3312_v48 = vmax.f32 %v3311_v52, 0.0  ;;  %v3314_v21 = vmax.f32 %v3313_v51, 0.0  ;;  %v3315_v22 = vld [vmem:[#allocation10_spill] sm:$0xff] }
 0x261   : > { %v3316_v61 = vmax.f32 %v3315_v22, 0.0  ;;  %v1310_v36 = vmax.f32 %v1262_v43, %v1278_v25  ;;  %v1312_v33 = vmax.f32 %v1264_v55, %v1280_v6  ;;  %v1313_v56 = vmax.f32 %v1265_v47, %v1281_v54 }
 0x262   : > { %v1306_v16 = vmax.f32 %v3310_v46, %v1258_v35  ;;  %v1307_v2 = vmax.f32 %v3312_v48, %v1259_v41  ;;  %v1308_v11 = vmax.f32 %v3314_v21, %v1260_v44  ;;  %v1314_v20 = vmax.f32 %v1266_v53, %v1282_v12 }
 0x263   : > { %v1309_v23 = vmax.f32 %v3316_v61, %v1261_v39  ;;  %v1315_v35 = vmax.f32 %v1267_v62, %v1283_v32  ;;  %v1316_v46 = vmax.f32 %v1268_v3, %v1284_v58  ;;  %v1317_v52 = vmax.f32 %v1269_v59, %v1285_v49 }
 0x264   : > { %v1318_v41 = vmax.f32 %v1270_v1, %v1286_v34  ;;  %v1319_v48 = vmax.f32 %v1271_v10, %v1287_v5  ;;  %v1320_v51 = vmax.f32 %v1272_v15, %v1288_v24  ;;  %v1321_v21 = vmax.f32 %v1273_v7, %v1289_v63 }
 0x265   : > { %v1322_v44 = vmax.f32 %v1274_v14, %v1290_v38  ;;  %v1323_v22 = vmax.f32 %v1275_v37, %v1291_v57  ;;  %v1324_v39 = vmax.f32 %v1276_v27, %v1292_v30  ;;  %v1325_v61 = vmax.f32 %v1277_v19, %v1293_v4 }
 0x266   : > { %v1326_v25 = vmax.f32 %v1294_v9, %v1310_v36  ;;  %v1327_v43 = vmax.f32 %v1295_v45, %v1311_v60  ;;  %v1328_v28 = vmax.f32 %v1296_v8, %v1312_v33  ;;  %v1329_v50 = vmax.f32 %v1297_v42, %v1313_v56 }
 0x267   : > { %v1330_v6 = vmax.f32 %v1298_v40, %v1314_v20  ;;  %v1331_v55 = vmax.f32 %v1299_v26, %v1315_v35  ;;  %v1332_v47 = vmax.f32 %v1300_v0, %v1316_v46  ;;  %v1333_v53 = vmax.f32 %v1301_v31, %v1317_v52 }
 0x268   : > { %v1334_v62 = vmax.f32 %v1302_v17, %v1318_v41  ;;  %v1335_v3 = vmax.f32 %v1303_v29, %v1319_v48  ;;  %v1336_v59 = vmax.f32 %v1304_v13, %v1320_v51  ;;  %v1337_v1 = vmax.f32 %v1305_v18, %v1321_v21 }
 0x269   : > { %v1338_v10 = vmax.f32 %v1306_v16, %v1322_v44  ;;  %v1339_v15 = vmax.f32 %v1307_v2, %v1323_v22  ;;  %v1340_v7 = vmax.f32 %v1308_v11, %v1324_v39  ;;  %v1341_v14 = vmax.f32 %v1309_v23, %v1325_v61 }
 0x26a   : > { %v1591_v9 = vpack.c.bf16 %v1327_v43, %v1326_v25  ;;  %v1596_v37 = vpack.c.bf16 %v1329_v50, %v1328_v28  ;;  %v1601_v8 = vpack.c.bf16 %v1331_v55, %v1330_v6  ;;  %v1606_v27 = vpack.c.bf16 %v1333_v53, %v1332_v47 }
 0x26b   : > { %v1611_v19 = vpack.c.bf16 %v1335_v3, %v1334_v62  ;;  %v1616_v54 = vpack.c.bf16 %v1337_v1, %v1336_v59  ;;  %v1621_v12 = vpack.c.bf16 %v1339_v15, %v1338_v10  ;;  %v1626_v32 = vpack.c.bf16 %v1341_v14, %v1340_v7 }
 0x26c   : > { %1592 = vst [vmem:[%s197_s30] sm:$0xff] %v1591_v9   ;;  %1628 = vst [vmem:[%s197_s30 + $0x8] sm:$0xff] %v1596_v37  }
 0x26d   : > { %1629 = vst [vmem:[%s197_s30 + $0x10] sm:$0xff] %v1601_v8   ;;  %1630 = vst [vmem:[%s197_s30 + $0x18] sm:$0xff] %v1606_v27  }
 0x26e   : > { %1631 = vst [vmem:[%s197_s30 + $0x20] sm:$0xff] %v1611_v19   ;;  %1632 = vst [vmem:[%s197_s30 + $0x28] sm:$0xff] %v1616_v54  }
 0x26f   : > { %1633 = vst [vmem:[%s197_s30 + $0x30] sm:$0xff] %v1621_v12   ;;  %1634 = vst [vmem:[%s197_s30 + $0x38] sm:$0xff] %v1626_v32  }
 0x270 PF: > { %s14_s15 = sadd.s32 1, %s1785_s15  }
 0x271   : > { %p11_p4 = scmp.ge.s32.totalorder %s14_s15, 4  }
 0x273   :  { %13 = sbr.rel (!%p11_p4) target bundleno = 1 (0x1), region = 66 }

// kernel: _lambda_.4
= control target key start
LH: loop header
LB: loop body
LE: loop exit
PB: predicated region body
PF: predicated region fallthrough
CT: control target
= control target key end

     0   :  { %s1227_s15 = smov 0   ;;  %s1444_s0 = inlined_call_operand.vmem [shape: bf16[2,128,288], index: 0, kind: input, shape index: {}]   ;;  %s1445_s1 = inlined_call_operand.vmem [shape: bf16[288,128], index: 1, kind: input, shape index: {}]   ;;  %s1446_s2 = inlined_call_operand.vmem [shape: f32[1,128], index: 2, kind: input, shape index: {}]   ;;  %s1447_s3 = inlined_call_operand.vmem [shape: f32[1,128], index: 3, kind: input, shape index: {}]   ;;  %s1448_s4 = inlined_call_operand.vmem [shape: bf16[2,32,128], index: 4, kind: output, shape index: {}]  }
   0x1 LB: > { %s942_s16 = sadd.s32 4294967295, %s1200_s15   ;;  %p946_p0 = scmp.ge.s32.totalorder %s1200_s15, 1  ;;  %s1200_s15 = sphi %s1227_s15, %s14_s15  }
   0x2   : > { %p162_p1 = scmp.lt.s32.totalorder %s1200_s15, 3 }
   0x4   : > { %p163_p2 = pnand %p946_p0, %p162_p1 }
   0x5   : > { %v1142_v0 = vld [vmem:[%s1445_s1 + $0x40] sm:$0xff] (!%p163_p2)   ;;  %v1144_v2 = vld [vmem:[%s1445_s1 + $0x48] sm:$0xff] (!%p163_p2)   ;;  %p188_p3 = scmp.lt.s32.totalorder (!%p163_p2), %s942_s16, 1  ;;  %v1146_v4 = vld [vmem:[%s1445_s1 + $0x50] sm:$0xff] (!%p163_p2)   ;;  %vm495_vm0 = vcmask (!%p163_p2), 261120  }
   0x6   : > { %166 = sbr.rel (%p163_p2) target bundleno = 408 (0x198), region = 36  ;;  %v1143_v1 = vld [vmem:[%s1445_s1] sm:$0xff] (!%p163_p2)   ;;  %1023 = vmatprep.subr.bf16.mxu0 (!%p163_p2), %v1142_v0  ;;  %1117 = vmatprep.subr.bf16.mxu1 (!%p163_p2), %v1142_v0  ;;  %v1145_v3 = vld [vmem:[%s1445_s1 + $0x8] sm:$0xff] (!%p163_p2)   ;;  %v1147_v5 = vld [vmem:[%s1445_s1 + $0x10] sm:$0xff] (!%p163_p2)  }
   0x7   : > { %1024 = vmatpush3.bf16.msra.mxu0 (!%p163_p2), %v1143_v1  ;;  %1125 = vmatpush3.bf16.msra.mxu1 (!%p163_p2), %v1143_v1  ;;  %v1148_v6 = vld [vmem:[%s1445_s1 + $0x58] sm:$0xff] (!%p163_p2)   ;;  %v1150_v8 = vld [vmem:[%s1445_s1 + $0x60] sm:$0xff] (!%p163_p2)   ;;  %v1152_v10 = vld [vmem:[%s1445_s1 + $0x68] sm:$0xff] (!%p163_p2)  }
   0x8   : > { %1025 = vmatprep.subr.bf16.mxu0 (!%p163_p2), %v1144_v2  ;;  %1118 = vmatprep.subr.bf16.mxu1 (!%p163_p2), %v1144_v2  ;;  %v1149_v7 = vld [vmem:[%s1445_s1 + $0x18] sm:$0xff] (!%p163_p2)   ;;  %v1151_v9 = vld [vmem:[%s1445_s1 + $0x20] sm:$0xff] (!%p163_p2)   ;;  %v1153_v13 = vld [vmem:[%s1445_s1 + $0x28] sm:$0xff] (!%p163_p2)  }
   0x9   : > { %v1154_v14 = vld [vmem:[%s1445_s1 + $0x70] sm:$0xff] (!%p163_p2)   ;;  %v1156_v16 = vld [vmem:[%s1445_s1 + $0x78] sm:$0xff] (!%p163_p2)   ;;  %v1164_v19 = vld [vmem:[%s1445_s1 + $0x80] sm:$0xff] (!%p163_p2)  }
   0xa   : > { %v1155_v15 = vld [vmem:[%s1445_s1 + $0x30] sm:$0xff] (!%p163_p2)   ;;  %v1157_v17 = vld [vmem:[%s1445_s1 + $0x38] sm:$0xff] (!%p163_p2)   ;;  %v1171_v23 = vld [vmem:[%s1445_s1 + $0x88] sm:$0xff] (!%p163_p2)  }
   0xb   : > { %1026 = vmatpush3.bf16.msra.mxu0 (!%p163_p2), %v1145_v3  ;;  %1126 = vmatpush3.bf16.msra.mxu1 (!%p163_p2), %v1145_v3 }
   0xc   : > { %1027 = vmatprep.subr.bf16.mxu0 (!%p163_p2), %v1146_v4  ;;  %1119 = vmatprep.subr.bf16.mxu1 (!%p163_p2), %v1146_v4 }
   0xd   : > { %s1450_s16 = smov (!%p188_p3, %s942_s16), 1 }
   0xe   : > { %s1133_s5 = smul.u32 192, %s1450_s16  ;;  %s1007_s11 = sshll.u32 %s1450_s16, 4 }
   0xf   : > { %1028 = vmatpush3.bf16.msra.mxu0 %v1147_v5  ;;  %1127 = vmatpush3.bf16.msra.mxu1 %v1147_v5  ;;  %s197_s14 = scalar_lea.vmem %s1448_s4, %s1007_s11 }
  0x10   : > { %1029 = vmatprep.subr.bf16.mxu0 %v1148_v6  ;;  %1120 = vmatprep.subr.bf16.mxu1 %v1148_v6  ;;  %s1268_s12 = scalar_lea.vmem %s1444_s0, %s1133_s5 }
  0x11   : > { %v1160_v11 = vld [vmem:[%s1268_s12 + $0x4] ss:$12 sps:$4 sm:$0xff]   ;;  %v1163_v12 = vld [vmem:[%s1268_s12 + $0x94] ss:$12 sps:$4 sm:$0xff]   ;;  %v1165_v21 = vld [vmem:[%s1268_s12 + $0x1c] ss:$12 sps:$4 sm:$0xff]  }
  0x12   : > { %552 = vmatprep.mubr.bf16.mxu0 %v1160_v11  ;;  %600 = vmatprep.mubr.bf16.mxu1 %v1163_v12  ;;  %v1158_v18 = vld [vmem:[%s1268_s12] ss:$12 sps:$4 sm:$0xff]   ;;  %v1161_v20 = vld [vmem:[%s1268_s12 + $0x90] ss:$12 sps:$4 sm:$0xff]   ;;  %v1169_v24 = vld [vmem:[%s1268_s12 + $0x18] ss:$12 sps:$4 sm:$0xff]  }
  0x13   : > { %1030 = vmatpush3.bf16.msra.mxu0 %v1149_v7  ;;  %1128 = vmatpush3.bf16.msra.mxu1 %v1149_v7  ;;  %v1167_v22 = vld [vmem:[%s1268_s12 + $0xac] ss:$12 sps:$4 sm:$0xff]   ;;  %v1170_v25 = vld [vmem:[%s1268_s12 + $0xa8] ss:$12 sps:$4 sm:$0xff]   ;;  %v1175_v28 = vld [vmem:[%s1268_s12 + $0x30] ss:$12 sps:$4 sm:$0xff]  }
  0x14   : > { %1031 = vmatprep.subr.bf16.mxu0 %v1150_v8  ;;  %1121 = vmatprep.subr.bf16.mxu1 %v1150_v8  ;;  %v1172_v26 = vld [vmem:[%s1268_s12 + $0x34] ss:$12 sps:$4 sm:$0xff]   ;;  %v1177_v30 = vld [vmem:[%s1268_s12 + $0x4c] ss:$12 sps:$4 sm:$0xff]   ;;  %v1181_v33 = vld [vmem:[%s1268_s12 + $0x50] ss:$12 sps:$4 sm:$0xff]  }
  0x15   : > { %v1174_v27 = vld [vmem:[%s1268_s12 + $0x8] ss:$12 sps:$4 sm:$0xff]   ;;  %v1176_v29 = vld [vmem:[%s1268_s12 + $0x20] ss:$12 sps:$4 sm:$0xff]   ;;  %v1179_v31 = vld [vmem:[%s1268_s12 + $0x38] ss:$12 sps:$4 sm:$0xff]  }
  0x16   : > { %v1180_v32 = vld [vmem:[%s1268_s12 + $0x48] ss:$12 sps:$4 sm:$0xff]   ;;  %v1182_v34 = vld [vmem:[%s1268_s12 + $0x64] ss:$12 sps:$4 sm:$0xff]   ;;  %v1185_v36 = vld [vmem:[%s1268_s12 + $0x60] ss:$12 sps:$4 sm:$0xff]  }
  0x17   : > { %1032 = vmatpush3.bf16.msra.mxu0 %v1151_v9  ;;  %1129 = vmatpush3.bf16.msra.mxu1 %v1151_v9  ;;  %v1184_v35 = vld [vmem:[%s1268_s12 + $0x68] ss:$12 sps:$4 sm:$0xff]   ;;  %v1186_v37 = vld [vmem:[%s1268_s12 + $0x80] ss:$12 sps:$4 sm:$0xff]   ;;  %v1189_v39 = vld [vmem:[%s1268_s12 + $0x98] ss:$12 sps:$4 sm:$0xff]  }
  0x18   : > { %1033 = vmatprep.subr.bf16.mxu0 %v1152_v10  ;;  %1122 = vmatprep.subr.bf16.mxu1 %v1152_v10  ;;  %v1187_v38 = vld [vmem:[%s1268_s12 + $0x7c] ss:$12 sps:$4 sm:$0xff]   ;;  %v1190_v40 = vld [vmem:[%s1268_s12 + $0x78] ss:$12 sps:$4 sm:$0xff]  }
  0x19   : > { %v1191_v41 = vld [vmem:[%s1268_s12 + $0xb0] ss:$12 sps:$4 sm:$0xff]  }
  0x1b   : > { %1034 = vmatpush3.bf16.msra.mxu0 %v1153_v13  ;;  %1130 = vmatpush3.bf16.msra.mxu1 %v1153_v13 }
  0x1c   : > { %1035 = vmatprep.subr.bf16.mxu0 %v1154_v14  ;;  %1123 = vmatprep.subr.bf16.mxu1 %v1154_v14 }
  0x1f   : > { %1036 = vmatpush3.bf16.msra.mxu0 %v1155_v15  ;;  %1131 = vmatpush3.bf16.msra.mxu1 %v1155_v15 }
  0x20   : > { %1037 = vmatprep.subr.bf16.mxu0 %v1156_v16  ;;  %1124 = vmatprep.subr.bf16.mxu1 %v1156_v16 }
  0x23   : > { %1038 = vmatpush3.bf16.msra.mxu0 %v1157_v17  ;;  %1132 = vmatpush3.bf16.msra.mxu1 %v1157_v17 }
  0x24   : > { %1097 = vmatprep.subr.bf16.mxu1 %v1164_v19 }
  0x26   : > { %553 = vmatmul.mubr.bf16.vlgmr.msra.gmra.mrb[0].mxu0 %v1158_v18  ;;  %601 = vmatmul.mubr.bf16.vlgmr.msra.gmra.mrb[0].mxu1 %v1161_v20 }
  0x27   : > { %1098 = vmatpush3.bf16.msra.mxu1 %v1164_v19  ;;  %560 = vmatprep.mubr.bf16.mxu0 %v1165_v21 }
  0x28   : > { %608 = vmatprep.mubr.bf16.mxu1 %v1167_v22  ;;  %1099 = vmatprep.subr.bf16.mxu1 %v1171_v23 }
  0x2b   : > { %1100 = vmatpush3.bf16.msra.mxu1 %v1171_v23 }
  0x2e   : > { %561 = vmatmul.mubr.bf16.gmra.mrb[4].mxu0 %v1169_v24  ;;  %609 = vmatmul.mubr.bf16.gmra.mrb[4].mxu1 %v1170_v25 }
  0x2f   : > { %568 = vmatprep.mubr.bf16.mxu0 %v1172_v26  ;;  %1101 = vmatprep.mubr.msk.bf16.mxu1 %vm495_vm0, %v1174_v27 }
  0x36   : > { %569 = vmatmul.mubr.bf16.gmra.mrb[8].mxu0 %v1175_v28  ;;  %1102 = vmatmul.mubr.msk.bf16.vlgmr.msra.gmra.mrb[8].mxu1 %vm495_vm0, %v1176_v29 }
  0x37   : > { %576 = vmatprep.mubr.bf16.mxu0 %v1177_v30  ;;  %1105 = vmatprep.mubr.msk.bf16.mxu1 %vm495_vm0, %v1179_v31 }
  0x3e   : > { %577 = vmatmul.mubr.bf16.gmra.mrb[12].mxu0 %v1180_v32  ;;  %1106 = vmatmul.mubr.msk.bf16.gmra.mrb[12].mxu1 %vm495_vm0, %v1181_v33 }
  0x3f   : > { %584 = vmatprep.mubr.bf16.mxu0 %v1182_v34  ;;  %1109 = vmatprep.mubr.msk.bf16.mxu1 %vm495_vm0, %v1184_v35 }
  0x46   : > { %585 = vmatmul.mubr.bf16.gmra.mrb[16].mxu0 %v1185_v36  ;;  %1110 = vmatmul.mubr.msk.bf16.gmra.mrb[16].mxu1 %vm495_vm0, %v1186_v37 }
  0x47   : > { %592 = vmatprep.mubr.bf16.mxu0 %v1187_v38  ;;  %1113 = vmatprep.mubr.msk.bf16.mxu1 %vm495_vm0, %v1189_v39 }
  0x4e   : > { %593 = vmatmul.mubr.bf16.gmra.mrb[20].mxu0 %v1190_v40  ;;  %1114 = vmatmul.mubr.msk.bf16.gmra.mrb[20].mxu1 %vm495_vm0, %v1191_v41 }
  0xf9   : > { %v1039_v42 = vpop.f32.mrb[0].mxu0  ;;  %v1075_v43 = vpop.f32.mrb[0].mxu1 }
  0xfa   : > { %v1040_v44 = vpop.f32.mrb[1].mxu0  ;;  %v1076_v45 = vpop.f32.mrb[1].mxu1 }
  0xfb   : > { %v1041_v46 = vadd.f32 %v1040_v44, %v1039_v42  ;;  %v1042_v47 = vpop.f32.mrb[2].mxu0  ;;  %v1329_v48 = vadd.f32 %v1076_v45, %v1075_v43  ;;  %v1078_v49 = vpop.f32.mrb[2].mxu1 }
  0xfc   : > { %v1043_v50 = vpop.f32.mrb[3].mxu0  ;;  %v1079_v51 = vpop.f32.mrb[3].mxu1 }
  0xfd   : > { %v1044_v52 = vadd.f32 %v1043_v50, %v1042_v47  ;;  %v1331_v53 = vadd.f32 %v1079_v51, %v1078_v49 }
 0x101   : > { %v1045_v54 = vpop.f32.mrb[4].mxu0  ;;  %v1081_v55 = vpop.f32.mrb[4].mxu1 }
 0x102   : > { %v1046_v56 = vpop.f32.mrb[5].mxu0  ;;  %v1082_v57 = vpop.f32.mrb[5].mxu1 }
 0x103   : > { %v1047_v58 = vadd.f32 %v1046_v56, %v1045_v54  ;;  %v1048_v59 = vpop.f32.mrb[6].mxu0  ;;  %v1083_v60 = vadd.f32 %v1082_v57, %v1081_v55  ;;  %v1084_v61 = vpop.f32.mrb[6].mxu1 }
 0x104   : > { %v1049_v62 = vpop.f32.mrb[7].mxu0  ;;  %v1085_v63 = vpop.f32.mrb[7].mxu1 }
 0x105   : > { %v1050_v0 = vadd.f32 %v1049_v62, %v1048_v59  ;;  %v1086_v1 = vadd.f32 %v1085_v63, %v1084_v61 }
 0x109   : > { %v1051_v2 = vpop.f32.mrb[8].mxu0  ;;  %v1103_v3 = vpop.f32.mrb[8].mxu1 }
 0x10a   : > { %v1333_v4 = vadd.f32 %v1103_v3, %v1047_v58  ;;  %v1052_v5 = vpop.f32.mrb[9].mxu0  ;;  %v651_v6 = vpop.f32.mrb[9].mxu1 }
 0x10b   : > { %v1053_v7 = vadd.f32 %v1052_v5, %v1051_v2  ;;  %v1335_v8 = vadd.f32 %v1041_v46, %v651_v6  ;;  %v1054_v9 = vpop.f32.mrb[10].mxu0  ;;  %v1104_v10 = vpop.f32.mrb[10].mxu1 }
 0x10c   : > { %v1337_v11 = vadd.f32 %v1104_v10, %v1050_v0  ;;  %v1055_v12 = vpop.f32.mrb[11].mxu0  ;;  %v654_v13 = vpop.f32.mrb[11].mxu1 }
 0x10d   : > { %v1056_v14 = vadd.f32 %v1055_v12, %v1054_v9  ;;  %v1339_v15 = vadd.f32 %v1044_v52, %v654_v13 }
 0x10f   : > { %v714_v16 = vadd.f32 %v1339_v15, %v1335_v8 }
 0x111   : > { %v715_v17 = vadd.f32 %v714_v16, %v1333_v4  ;;  %v1057_v18 = vpop.f32.mrb[12].mxu0  ;;  %v1107_v19 = vpop.f32.mrb[12].mxu1 }
 0x112   : > { %v1058_v20 = vpop.f32.mrb[13].mxu0  ;;  %v667_v21 = vpop.f32.mrb[13].mxu1 }
 0x113   : > { %v1059_v22 = vadd.f32 %v1058_v20, %v1057_v18  ;;  %v668_v23 = vadd.f32 %v1053_v7, %v667_v21  ;;  %v716_v24 = vadd.f32 %v715_v17, %v1337_v11  ;;  %v1060_v25 = vpop.f32.mrb[14].mxu0  ;;  %v1108_v26 = vpop.f32.mrb[14].mxu1 }
 0x114   : > { %v1061_v27 = vpop.f32.mrb[15].mxu0  ;;  %v670_v28 = vpop.f32.mrb[15].mxu1 }
 0x115   : > { %v676_v29 = vadd.f32 %v1107_v19, %v1059_v22  ;;  %v717_v30 = vadd.f32 %v716_v24, %v668_v23  ;;  %v1062_v31 = vadd.f32 %v1061_v27, %v1060_v25  ;;  %v671_v32 = vadd.f32 %v1056_v14, %v670_v28 }
 0x117   : > { %v679_v33 = vadd.f32 %v1108_v26, %v1062_v31  ;;  %v718_v34 = vadd.f32 %v717_v30, %v671_v32 }
 0x119   : > { %v719_v35 = vadd.f32 %v718_v34, %v676_v29  ;;  %v1063_v36 = vpop.f32.mrb[16].mxu0  ;;  %v1111_v37 = vpop.f32.mrb[16].mxu1 }
 0x11a   : > { %v1064_v38 = vpop.f32.mrb[17].mxu0  ;;  %v683_v39 = vpop.f32.mrb[17].mxu1 }
 0x11b   : > { %v1065_v40 = vadd.f32 %v1064_v38, %v1063_v36  ;;  %v1066_v41 = vpop.f32.mrb[18].mxu0  ;;  %v720_v42 = vadd.f32 %v719_v35, %v679_v33  ;;  %v1112_v43 = vpop.f32.mrb[18].mxu1 }
 0x11c   : > { %v1067_v44 = vpop.f32.mrb[19].mxu0  ;;  %v686_v45 = vpop.f32.mrb[19].mxu1 }
 0x11d   : > { %v1068_v46 = vadd.f32 %v1067_v44, %v1066_v41  ;;  %v684_v47 = vadd.f32 %v1065_v40, %v683_v39 }
 0x11f   : > { %v721_v49 = vadd.f32 %v720_v42, %v684_v47  ;;  %v687_v50 = vadd.f32 %v1068_v46, %v686_v45 }
 0x121   : > { %v722_v51 = vadd.f32 %v721_v49, %v687_v50  ;;  %v1069_v52 = vpop.f32.mrb[20].mxu0  ;;  %v1115_v54 = vpop.f32.mrb[20].mxu1 }
 0x122   : > { %v708_v55 = vadd.f32 %v1115_v54, %v1083_v60  ;;  %v1070_v56 = vpop.f32.mrb[21].mxu0  ;;  %v699_v57 = vpop.f32.mrb[21].mxu1 }
 0x123   : > { %v1071_v58 = vadd.f32 %v1070_v56, %v1069_v52  ;;  %v700_v59 = vadd.f32 %v1329_v48, %v699_v57  ;;  %v1072_v61 = vpop.f32.mrb[22].mxu0  ;;  %v1116_v62 = vpop.f32.mrb[22].mxu1 }
 0x124   : > { %v711_v63 = vadd.f32 %v1116_v62, %v1086_v1  ;;  %v1073_v0 = vpop.f32.mrb[23].mxu0  ;;  %v702_v2 = vpop.f32.mrb[23].mxu1 }
 0x125   : > { %v692_v3 = vadd.f32 %v1111_v37, %v1071_v58  ;;  %v1074_v5 = vadd.f32 %v1073_v0, %v1072_v61  ;;  %v703_v6 = vadd.f32 %v1331_v53, %v702_v2 }
 0x127   : > { %v723_v7 = vadd.f32 %v722_v51, %v692_v3  ;;  %v695_v9 = vadd.f32 %v1112_v43, %v1074_v5 }
 0x129   : > { %v724_v10 = vadd.f32 %v723_v7, %v695_v9 }
 0x12b   : > { %v725_v12 = vadd.f32 %v724_v10, %v700_v59 }
 0x12d   : > { %v726_v13 = vadd.f32 %v725_v12, %v703_v6 }
 0x12f   : > { %v727_v60 = vadd.f32 %v726_v13, %v708_v55 }
 0x131   : > { %v728_v14 = vadd.f32 %v727_v60, %v711_v63  ;;  %v795_v60 = vlaneseq }
 0x133   : > { %v729_v16 = vrot.slane %v728_v14, 4 }
 0x135   : > { %v730_v17 = vadd.f32 %v729_v16, %v728_v14  ;;  %v796_v14 = vshrl.u32 %v795_v60, 7  ;;  %v790_v16 = vld [vmem:[%s1446_s2] sm:$0x1] }
 0x137   : > { %v731_v18 = vrot.slane %v730_v17, 2 }
 0x139   : > { %v732_v48 = vadd.f32 %v731_v18, %v730_v17  ;;  %v797_v17 = vsub.s32 0, %v796_v14 }
 0x13b   : > { %v733_v19 = vrot.slane %v732_v48, 1 }
 0x13d   : > { %v734_v20 = vadd.f32 %v733_v19, %v732_v48 }
 0x13f   : > { %v735_v1 = vmul.f32 0.0078125, %v734_v20 }
 0x141   : > { %v1348_v21 = vsub.f32 %v1335_v8, %v735_v1  ;;  %v1351_v22 = vsub.f32 %v1339_v15, %v735_v1  ;;  %v1354_v53 = vsub.f32 %v1333_v4, %v735_v1  ;;  %v1357_v24 = vsub.f32 %v1337_v11, %v735_v1 }
 0x142   : > { %v1359_v25 = vsub.f32 %v668_v23, %v735_v1  ;;  %v1361_v26 = vsub.f32 %v671_v32, %v735_v1  ;;  %v1363_v27 = vsub.f32 %v676_v29, %v735_v1  ;;  %v1365_v28 = vsub.f32 %v679_v33, %v735_v1 }
 0x143   : > { %v1367_v30 = vsub.f32 %v684_v47, %v735_v1  ;;  %v1369_v8 = vsub.f32 %v687_v50, %v735_v1  ;;  %v1371_v15 = vsub.f32 %v692_v3, %v735_v1  ;;  %v1373_v31 = vsub.f32 %v695_v9, %v735_v1 }
 0x144   : > { %v1375_v4 = vsub.f32 %v700_v59, %v735_v1  ;;  %v1377_v11 = vsub.f32 %v703_v6, %v735_v1  ;;  %v1379_v23 = vsub.f32 %v708_v55, %v735_v1  ;;  %v1381_v32 = vsub.f32 %v711_v63, %v735_v1 }
 0x145   : > { %v752_v29 = vmul.f32 %v1348_v21, %v1348_v21  ;;  %v753_v33 = vmul.f32 %v1351_v22, %v1351_v22  ;;  %v754_v34 = vmul.f32 %v1354_v53, %v1354_v53  ;;  %v755_v36 = vmul.f32 %v1357_v24, %v1357_v24 }
 0x146   : > { %v756_v38 = vmul.f32 %v1359_v25, %v1359_v25  ;;  %v757_v40 = vmul.f32 %v1361_v26, %v1361_v26  ;;  %v758_v42 = vmul.f32 %v1363_v27, %v1363_v27  ;;  %v759_v44 = vmul.f32 %v1365_v28, %v1365_v28 }
 0x147   : > { %v768_v35 = vadd.f32 %v753_v33, %v752_v29  ;;  %v760_v46 = vmul.f32 %v1367_v30, %v1367_v30  ;;  %v761_v49 = vmul.f32 %v1369_v8, %v1369_v8  ;;  %v762_v51 = vmul.f32 %v1371_v15, %v1371_v15 }
 0x148   : > { %v763_v54 = vmul.f32 %v1373_v31, %v1373_v31  ;;  %v764_v56 = vmul.f32 %v1375_v4, %v1375_v4  ;;  %v765_v58 = vmul.f32 %v1377_v11, %v1377_v11  ;;  %v766_v61 = vmul.f32 %v1379_v23, %v1379_v23 }
 0x149   : > { %v769_v37 = vadd.f32 %v768_v35, %v754_v34  ;;  %v767_v63 = vmul.f32 %v1381_v32, %v1381_v32 }
 0x14b   : > { %v770_v39 = vadd.f32 %v769_v37, %v755_v36 }
 0x14d   : > { %v771_v41 = vadd.f32 %v770_v39, %v756_v38  ;;  %v1000_v38 = vld [vmem:[%s1447_s3] ss:$0 sm:$0xff] }
 0x14f   : > { %v772_v43 = vadd.f32 %v771_v41, %v757_v40 }
 0x151   : > { %v773_v45 = vadd.f32 %v772_v43, %v758_v42 }
 0x153   : > { %v774_v47 = vadd.f32 %v773_v45, %v759_v44 }
 0x155   : > { %v775_v50 = vadd.f32 %v774_v47, %v760_v46 }
 0x157   : > { %v776_v52 = vadd.f32 %v775_v50, %v761_v49 }
 0x159   : > { %v777_v55 = vadd.f32 %v776_v52, %v762_v51 }
 0x15b   : > { %v778_v57 = vadd.f32 %v777_v55, %v763_v54 }
 0x15d   : > { %v779_v59 = vadd.f32 %v778_v57, %v764_v56 }
 0x15f   : > { %v780_v62 = vadd.f32 %v779_v59, %v765_v58 }
 0x161   : > { %v781_v0 = vadd.f32 %v780_v62, %v766_v61 }
 0x163   : > { %v782_v2 = vadd.f32 %v781_v0, %v767_v63 }
 0x165   : > { %v783_v3 = vrot.slane %v782_v2, 4 }
 0x167   : > { %v784_v5 = vadd.f32 %v783_v3, %v782_v2 }
 0x169   : > { %v785_v6 = vrot.slane %v784_v5, 2 }
 0x16b   : > { %v786_v7 = vadd.f32 %v785_v6, %v784_v5 }
 0x16d   : > { %v787_v9 = vrot.slane %v786_v7, 1 }
 0x16f   : > { %v788_v10 = vadd.f32 %v787_v9, %v786_v7 }
 0x171   : > { %v789_v12 = vmul.f32 0.0078125, %v788_v10 }
 0x173   : > { %v791_v13 = vadd.f32 1e-05, %v789_v12 }
 0x175   : > { %1192 = vrsqrt.f32 %v791_v13 }
 0x17f   : > { %v1193_v18 = vpop.eup %1192 }
 0x180   : > { %v793_v48 = vmul.f32 %v1193_v18, %v790_v16 }
 0x182   : > { %v798_v19 = vrot.slane %v793_v48, %v797_v17 }
 0x184   : > { %v800_v20 = vmul.f32 %v798_v19, %v1348_v21  ;;  %v801_v1 = vmul.f32 %v798_v19, %v1351_v22  ;;  %v802_v29 = vmul.f32 %v798_v19, %v1354_v53  ;;  %v803_v33 = vmul.f32 %v798_v19, %v1357_v24 }
 0x185   : > { %v804_v34 = vmul.f32 %v798_v19, %v1359_v25  ;;  %v805_v35 = vmul.f32 %v798_v19, %v1361_v26  ;;  %v806_v36 = vmul.f32 %v798_v19, %v1363_v27  ;;  %v807_v37 = vmul.f32 %v798_v19, %v1365_v28 }
 0x186   : > { %v808_v21 = vmul.f32 %v798_v19, %v1367_v30  ;;  %v809_v22 = vmul.f32 %v798_v19, %v1369_v8  ;;  %v810_v53 = vmul.f32 %v798_v19, %v1371_v15  ;;  %v811_v24 = vmul.f32 %v798_v19, %v1373_v31 }
 0x187   : > { %v812_v25 = vmul.f32 %v798_v19, %v1375_v4  ;;  %v813_v26 = vmul.f32 %v798_v19, %v1377_v11  ;;  %v814_v27 = vmul.f32 %v798_v19, %v1379_v23  ;;  %v815_v28 = vmul.f32 %v798_v19, %v1381_v32 }
 0x188   : > { %v823_v39 = vadd.f32 %v1000_v38, %v800_v20  ;;  %v824_v40 = vadd.f32 %v1000_v38, %v801_v1  ;;  %v825_v41 = vadd.f32 %v1000_v38, %v802_v29  ;;  %v826_v42 = vadd.f32 %v1000_v38, %v803_v33 }
 0x189   : > { %v827_v43 = vadd.f32 %v1000_v38, %v804_v34  ;;  %v828_v30 = vadd.f32 %v1000_v38, %v805_v35  ;;  %v829_v44 = vadd.f32 %v1000_v38, %v806_v36  ;;  %v830_v8 = vadd.f32 %v1000_v38, %v807_v37 }
 0x18a   : > { %v831_v45 = vadd.f32 %v1000_v38, %v808_v21  ;;  %v832_v15 = vadd.f32 %v1000_v38, %v809_v22  ;;  %v833_v46 = vadd.f32 %v1000_v38, %v810_v53  ;;  %v834_v31 = vadd.f32 %v1000_v38, %v811_v24 }
 0x18b   : > { %v835_v47 = vadd.f32 %v1000_v38, %v812_v25  ;;  %v836_v4 = vadd.f32 %v1000_v38, %v813_v26  ;;  %v837_v49 = vadd.f32 %v1000_v38, %v814_v27  ;;  %v838_v11 = vadd.f32 %v1000_v38, %v815_v28 }
 0x18c   : > { %v839_v50 = vmax.f32 %v823_v39, 0.0  ;;  %v840_v23 = vmax.f32 %v824_v40, 0.0  ;;  %v841_v51 = vmax.f32 %v825_v41, 0.0  ;;  %v842_v32 = vmax.f32 %v826_v42, 0.0 }
 0x18d   : > { %v843_v52 = vmax.f32 %v827_v43, 0.0  ;;  %v844_v54 = vmax.f32 %v828_v30, 0.0  ;;  %v845_v55 = vmax.f32 %v829_v44, 0.0  ;;  %v846_v56 = vmax.f32 %v830_v8, 0.0 }
 0x18e   : > { %v847_v57 = vmax.f32 %v831_v45, 0.0  ;;  %v848_v58 = vmax.f32 %v832_v15, 0.0  ;;  %v849_v59 = vmax.f32 %v833_v46, 0.0  ;;  %v850_v61 = vmax.f32 %v834_v31, 0.0 }
 0x18f   : > { %v851_v62 = vmax.f32 %v835_v47, 0.0  ;;  %v852_v63 = vmax.f32 %v836_v4, 0.0  ;;  %v853_v0 = vmax.f32 %v837_v49, 0.0  ;;  %v854_v2 = vmax.f32 %v838_v11, 0.0 }
 0x190   : > { %v855_v3 = vmax.f32 %v839_v50, %v843_v52  ;;  %v856_v5 = vmax.f32 %v840_v23, %v844_v54  ;;  %v857_v6 = vmax.f32 %v841_v51, %v845_v55  ;;  %v858_v7 = vmax.f32 %v842_v32, %v846_v56 }
 0x191   : > { %v859_v9 = vmax.f32 %v847_v57, %v851_v62  ;;  %v860_v10 = vmax.f32 %v848_v58, %v852_v63  ;;  %v861_v12 = vmax.f32 %v849_v59, %v853_v0  ;;  %v862_v13 = vmax.f32 %v850_v61, %v854_v2 }
 0x193   : > { %v863_v60 = vmax.f32 %v855_v3, %v859_v9  ;;  %v864_v14 = vmax.f32 %v856_v5, %v860_v10  ;;  %v865_v16 = vmax.f32 %v857_v6, %v861_v12  ;;  %v866_v17 = vmax.f32 %v858_v7, %v862_v13 }
 0x195   : > { %v1015_v18 = vpack.c.bf16 %v864_v14, %v863_v60  ;;  %v1020_v48 = vpack.c.bf16 %v866_v17, %v865_v16 }
 0x197   : > { %1016 = vst [vmem:[%s197_s14] sm:$0xff] %v1015_v18   ;;  %1022 = vst [vmem:[%s197_s14 + $0x8] sm:$0xff] %v1020_v48  }
 0x198 PF: > { %s14_s15 = sadd.s32 1, %s1200_s15  }
 0x199   : > { %p11_p4 = scmp.ge.s32.totalorder %s14_s15, 4  }
 0x19b   :  { %13 = sbr.rel (!%p11_p4) target bundleno = 1 (0x1), region = 66 }

// kernel: _lambda_.5
= control target key start
LH: loop header
LB: loop body
LE: loop exit
PB: predicated region body
PF: predicated region fallthrough
CT: control target
= control target key end

     0   :  { %s1542_s27 = smov 0   ;;  %s1811_s0 = inlined_call_operand.vmem [shape: bf16[2,32,576], index: 0, kind: input, shape index: {}]   ;;  %s1812_s1 = inlined_call_operand.vmem [shape: bf16[576,128], index: 1, kind: input, shape index: {}]   ;;  %s1813_s2 = inlined_call_operand.vmem [shape: f32[1,128], index: 2, kind: input, shape index: {}]   ;;  %s1814_s3 = inlined_call_operand.vmem [shape: f32[1,128], index: 3, kind: input, shape index: {}]   ;;  %s1815_s4 = inlined_call_operand.vmem [shape: f32[128,128], index: 4, kind: input, shape index: {}]   ;;  %s1816_s5 = inlined_call_operand.vmem [shape: f32[1,128], index: 5, kind: input, shape index: {}]   ;;  %s1817_s6 = inlined_call_operand.vmem [shape: f32[128,128], index: 6, kind: input, shape index: {}]   ;;  %s1818_s7 = inlined_call_operand.vmem [shape: f32[1,128], index: 7, kind: input, shape index: {}]   ;;  %s1819_s8 = inlined_call_operand.vmem [shape: f32[2,2,128], index: 8, kind: output, shape index: {}]  }
   0x1 LB: > { %s1136_s28 = sadd.s32 4294967295, %s1492_s27   ;;  %p1140_p0 = scmp.ge.s32.totalorder %s1492_s27, 1  ;;  %s1492_s27 = sphi %s1542_s27, %s18_s27  }
   0x2   : > { %p262_p1 = scmp.lt.s32.totalorder %s1492_s27, 3 }
   0x4   : > { %p263_p2 = pnand %p1140_p0, %p262_p1 }
   0x5   : > { %v1434_v0 = vld [vmem:[%s1812_s1 + $0x40] sm:$0xff] (!%p263_p2)   ;;  %v1438_v4 = vld [vmem:[%s1812_s1 + $0x48] sm:$0xff] (!%p263_p2)   ;;  %v1442_v8 = vld [vmem:[%s1812_s1 + $0x50] sm:$0xff] (!%p263_p2)   ;;  %p295_p3 = scmp.lt.s32.totalorder (!%p263_p2), %s1136_s28, 1  ;;  %vm655_vm0 = vcmask (!%p263_p2), 523264   ;;  %v1494_v49 = vmov (!%p263_p2), 0.0|0.0  }
   0x6   : > { %266 = sbr.rel (%p263_p2) target bundleno = 793 (0x319), region = 52  ;;  %v1435_v1 = vld [vmem:[%s1812_s1 + $0xc0] sm:$0xff] (!%p263_p2)   ;;  %1196 = vmatprep.subr.bf16.mxu0 (!%p263_p2), %v1434_v0  ;;  %v1439_v5 = vld [vmem:[%s1812_s1 + $0xc8] sm:$0xff] (!%p263_p2)   ;;  %v1443_v9 = vld [vmem:[%s1812_s1 + $0xd0] sm:$0xff] (!%p263_p2)   ;;  %vm1495_vm1 = vmmov (!%p263_p2), 0   ;;  %vm872_vm2 = vcmask (!%p263_p2), 1043456  }
   0x7   : > { %v1436_v2 = vld [vmem:[%s1812_s1] sm:$0xff] (!%p263_p2)   ;;  %1224 = vmatprep.subr.bf16.mxu1 (!%p263_p2), %v1435_v1  ;;  %v1440_v6 = vld [vmem:[%s1812_s1 + $0x8] sm:$0xff] (!%p263_p2)   ;;  %v1444_v10 = vld [vmem:[%s1812_s1 + $0x10] sm:$0xff] (!%p263_p2)   ;;  %vm915_vm3 = vcmask (!%p263_p2), 1041409  }
   0x8   : > { %v1437_v3 = vld [vmem:[%s1812_s1 + $0x80] sm:$0xff] (!%p263_p2)   ;;  %1197 = vmatpush3.bf16.msra.mxu0 (!%p263_p2), %v1436_v2  ;;  %v1441_v7 = vld [vmem:[%s1812_s1 + $0x88] sm:$0xff] (!%p263_p2)   ;;  %v1445_v11 = vld [vmem:[%s1812_s1 + $0x90] sm:$0xff] (!%p263_p2)  }
   0x9   : > { %1225 = vmatpush3.bf16.msra.mxu1 (!%p263_p2), %v1437_v3  ;;  %1198 = vmatprep.subr.bf16.mxu0 (!%p263_p2), %v1438_v4  ;;  %v1446_v12 = vld [vmem:[%s1812_s1 + $0x58] sm:$0xff] (!%p263_p2)   ;;  %v1450_v16 = vld [vmem:[%s1812_s1 + $0x60] sm:$0xff] (!%p263_p2)   ;;  %v1454_v20 = vld [vmem:[%s1812_s1 + $0x68] sm:$0xff] (!%p263_p2)   ;;  %v1496_v3 = vmov (!%p263_p2), 0.0  }
   0xa   : > { %1226 = vmatprep.subr.bf16.mxu1 (!%p263_p2), %v1439_v5  ;;  %v1447_v13 = vld [vmem:[%s1812_s1 + $0xd8] sm:$0xff] (!%p263_p2)   ;;  %v1451_v17 = vld [vmem:[%s1812_s1 + $0xe0] sm:$0xff] (!%p263_p2)   ;;  %v1455_v21 = vld [vmem:[%s1812_s1 + $0xe8] sm:$0xff] (!%p263_p2)  }
   0xb   : > { %v1448_v14 = vld [vmem:[%s1812_s1 + $0x18] sm:$0xff] (!%p263_p2)   ;;  %v1452_v18 = vld [vmem:[%s1812_s1 + $0x20] sm:$0xff] (!%p263_p2)   ;;  %v1456_v22 = vld [vmem:[%s1812_s1 + $0x28] sm:$0xff] (!%p263_p2)  }
   0xc   : > { %1199 = vmatpush3.bf16.msra.mxu0 (!%p263_p2), %v1440_v6  ;;  %v1449_v15 = vld [vmem:[%s1812_s1 + $0x98] sm:$0xff] (!%p263_p2)   ;;  %v1453_v19 = vld [vmem:[%s1812_s1 + $0xa0] sm:$0xff] (!%p263_p2)   ;;  %v1457_v23 = vld [vmem:[%s1812_s1 + $0xa8] sm:$0xff] (!%p263_p2)  }
   0xd   : > { %1227 = vmatpush3.bf16.msra.mxu1 %v1441_v7  ;;  %1200 = vmatprep.subr.bf16.mxu0 %v1442_v8  ;;  %s1821_s28 = smov (!%p295_p3, %s1136_s28), 1  ;;  %v1458_v24 = vld [vmem:[%s1812_s1 + $0x70] sm:$0xff]   ;;  %v1462_v28 = vld [vmem:[%s1812_s1 + $0x78] sm:$0xff]   ;;  %v1472_v36 = vld [vmem:[%s1812_s1 + $0x100] sm:$0xff]  }
   0xe   : > { %1228 = vmatprep.subr.bf16.mxu1 %v1443_v9  ;;  %v1459_v25 = vld [vmem:[%s1812_s1 + $0xf0] sm:$0xff]   ;;  %s1422_s19 = smul.u32 80, %s1821_s28  ;;  %v1463_v29 = vld [vmem:[%s1812_s1 + $0xf8] sm:$0xff]   ;;  %v1473_v37 = vld [vmem:[%s1812_s1 + $0x108] sm:$0xff]   ;;  %s1142_s13 = sshll.u32 %s1821_s28, 1 }
   0xf   : > { %v1460_v26 = vld [vmem:[%s1812_s1 + $0x30] sm:$0xff]   ;;  %v1464_v30 = vld [vmem:[%s1812_s1 + $0x38] sm:$0xff]   ;;  %v890_v46 = vld [vmem:[%s1815_s4] sm:$0xff]  ;;  %s303_s18 = scalar_lea.vmem %s1819_s8, %s1142_s13 }
  0x10   : > { %1201 = vmatpush3.bf16.msra.mxu0 %v1444_v10  ;;  %v1461_v27 = vld [vmem:[%s1812_s1 + $0xb0] sm:$0xff]   ;;  %s1650_s10 = scalar_lea.vmem %s1811_s0, %s1422_s19  ;;  %v1465_v31 = vld [vmem:[%s1812_s1 + $0xb8] sm:$0xff]   ;;  %v891_v47 = vld [vmem:[%s1815_s4 + $0x8] sm:$0xff] }
  0x11   : > { %1229 = vmatpush3.bf16.msra.mxu1 %v1445_v11  ;;  %1202 = vmatprep.subr.bf16.mxu0 %v1446_v12  ;;  %v1466_v32 = vld [vmem:[%s1650_s10] ss:$20 sps:$4 sm:$0xff]   ;;  %v1468_v33 = vld [vmem:[%s1650_s10 + $0x4] ss:$20 sps:$4 sm:$0xff]   ;;  %v1469_v34 = vld [vmem:[%s1650_s10 + $0x8] ss:$20 sps:$4 sm:$0xff]   ;;  %v1375_v48 = vpack.c.bf16 %v891_v47, %v890_v46 }
  0x12   : > { %1230 = vmatprep.subr.bf16.mxu1 %v1447_v13  ;;  %v1471_v35 = vld [vmem:[%s1650_s10 + $0xc] ss:$20 sps:$4 sm:$0xff]   ;;  %694 = vmatprep.mubr.bf16.mxu0 %v1468_v33  ;;  %v1476_v39 = vld [vmem:[%s1650_s10 + $0x34] ss:$20 sps:$4 sm:$0xff]   ;;  %v1479_v42 = vld [vmem:[%s1650_s10 + $0x30] ss:$20 sps:$4 sm:$0xff]  }
  0x13   : > { %743 = vmatprep.mubr.bf16.mxu1 %v1471_v35  ;;  %v1474_v38 = vld [vmem:[%s1650_s10 + $0x2c] ss:$20 sps:$4 sm:$0xff]   ;;  %v1478_v40 = vld [vmem:[%s1650_s10 + $0x28] ss:$20 sps:$4 sm:$0xff]   ;;  %v1480_v41 = vld [vmem:[%s1812_s1 + $0x110] sm:$0xff]  }
  0x14   : > { %1203 = vmatpush3.bf16.msra.mxu0 %v1448_v14  ;;  %v1482_v43 = vld [vmem:[%s1650_s10 + $0x10] ss:$20 sps:$4 sm:$0xff]   ;;  %v1481_v44 = vld [vmem:[%s1812_s1 + $0x118] sm:$0xff]   ;;  %v895_v54 = vld [vmem:[%s1815_s4 + $0x28] sm:$0xff] }
  0x15   : > { %1231 = vmatpush3.bf16.msra.mxu1 %v1449_v15  ;;  %1204 = vmatprep.subr.bf16.mxu0 %v1450_v16  ;;  %v1483_v45 = vld [vmem:[%s1650_s10 + $0x38] ss:$20 sps:$4 sm:$0xff]   ;;  %v892_v50 = vld [vmem:[%s1815_s4 + $0x10] sm:$0xff]  ;;  %v894_v53 = vld [vmem:[%s1815_s4 + $0x20] sm:$0xff] }
  0x16   : > { %1232 = vmatprep.subr.bf16.mxu1 %v1451_v17  ;;  %v893_v51 = vld [vmem:[%s1815_s4 + $0x18] sm:$0xff]  ;;  %v1381_v55 = vpack.c.bf16 %v895_v54, %v894_v53  ;;  %v896_v56 = vld [vmem:[%s1815_s4 + $0x30] sm:$0xff]  ;;  %v898_v59 = vld [vmem:[%s1815_s4 + $0x40] sm:$0xff] }
  0x17   : > { %v1378_v52 = vpack.c.bf16 %v893_v51, %v892_v50  ;;  %v897_v57 = vld [vmem:[%s1815_s4 + $0x38] sm:$0xff]  ;;  %v899_v60 = vld [vmem:[%s1815_s4 + $0x48] sm:$0xff]  ;;  %v900_v62 = vld [vmem:[%s1815_s4 + $0x50] sm:$0xff] }
  0x18   : > { %1205 = vmatpush3.bf16.msra.mxu0 %v1452_v18  ;;  %v1384_v58 = vpack.c.bf16 %v897_v57, %v896_v56  ;;  %v1387_v61 = vpack.c.bf16 %v899_v60, %v898_v59  ;;  %v901_v63 = vld [vmem:[%s1815_s4 + $0x58] sm:$0xff]  ;;  %v902_v1 = vld [vmem:[%s1815_s4 + $0x60] sm:$0xff]  ;;  %v903_v2 = vld [vmem:[%s1815_s4 + $0x68] sm:$0xff] }
  0x19   : > { %1233 = vmatpush3.bf16.msra.mxu1 %v1453_v19  ;;  %1206 = vmatprep.subr.bf16.mxu0 %v1454_v20  ;;  %v1390_v0 = vpack.c.bf16 %v901_v63, %v900_v62  ;;  %v1393_v4 = vpack.c.bf16 %v903_v2, %v902_v1  ;;  %v904_v5 = vld [vmem:[%s1815_s4 + $0x70] sm:$0xff]  ;;  %v905_v6 = vld [vmem:[%s1815_s4 + $0x78] sm:$0xff]  ;;  %v989_v8 = vld [vmem:[%s1817_s6] sm:$0xff] }
  0x1a   : > { %1234 = vmatprep.subr.bf16.mxu1 %v1455_v21  ;;  %v1396_v7 = vpack.c.bf16 %v905_v6, %v904_v5  ;;  %v990_v9 = vld [vmem:[%s1817_s6 + $0x8] sm:$0xff]  ;;  %v991_v10 = vld [vmem:[%s1817_s6 + $0x10] sm:$0xff]  ;;  %v992_v12 = vld [vmem:[%s1817_s6 + $0x18] sm:$0xff] }
  0x1b   : > { %v1399_v11 = vpack.c.bf16 %v990_v9, %v989_v8  ;;  %v1402_v13 = vpack.c.bf16 %v992_v12, %v991_v10  ;;  %v993_v14 = vld [vmem:[%s1817_s6 + $0x20] sm:$0xff]  ;;  %v994_v15 = vld [vmem:[%s1817_s6 + $0x28] sm:$0xff]  ;;  %v995_v17 = vld [vmem:[%s1817_s6 + $0x30] sm:$0xff] }
  0x1c   : > { %1207 = vmatpush3.bf16.msra.mxu0 %v1456_v22  ;;  %v1405_v16 = vpack.c.bf16 %v994_v15, %v993_v14  ;;  %v996_v18 = vld [vmem:[%s1817_s6 + $0x38] sm:$0xff]  ;;  %v997_v20 = vld [vmem:[%s1817_s6 + $0x40] sm:$0xff]  ;;  %v998_v21 = vld [vmem:[%s1817_s6 + $0x48] sm:$0xff] }
  0x1d   : > { %1235 = vmatpush3.bf16.msra.mxu1 %v1457_v23  ;;  %1208 = vmatprep.subr.bf16.mxu0 %v1458_v24  ;;  %v1408_v19 = vpack.c.bf16 %v996_v18, %v995_v17  ;;  %v1411_v22 = vpack.c.bf16 %v998_v21, %v997_v20  ;;  %v999_v24 = vld [vmem:[%s1817_s6 + $0x50] sm:$0xff] }
  0x1e   : > { %1236 = vmatprep.subr.bf16.mxu1 %v1459_v25  ;;  %v1000_v25 = vld [vmem:[%s1817_s6 + $0x58] sm:$0xff] }
  0x20   : > { %1209 = vmatpush3.bf16.msra.mxu0 %v1460_v26 }
  0x21   : > { %1237 = vmatpush3.bf16.msra.mxu1 %v1461_v27  ;;  %1210 = vmatprep.subr.bf16.mxu0 %v1462_v28 }
  0x22   : > { %1238 = vmatprep.subr.bf16.mxu1 %v1463_v29 }
  0x24   : > { %1211 = vmatpush3.bf16.msra.mxu0 %v1464_v30 }
  0x25   : > { %1239 = vmatpush3.bf16.msra.mxu1 %v1465_v31  ;;  %1292 = vmatprep.subr.bf16.mxu0 %v1472_v36 }
  0x26   : > { %1374 = vmatprep.subr.bf16.mxu1 %v1494_v49 }
  0x27   : > { %695 = vmatmul.mubr.bf16.vlgmr.msra.gmra.mrb[0].mxu0 %v1466_v32 }
  0x28   : > { %744 = vmatmul.mubr.bf16.vlgmr.msra.gmra.mrb[0].mxu1 %v1469_v34  ;;  %1293 = vmatpush3.bf16.msra.mxu0 %v1472_v36  ;;  %v1414_v34 = vpack.c.bf16 %v1000_v25, %v999_v24 }
  0x29   : > { %1294 = vmatprep.subr.bf16.mxu0 %v1473_v37  ;;  %702 = vmatprep.mubr.bf16.mxu0 %v1474_v38  ;;  %v1002_v38 = vld [vmem:[%s1817_s6 + $0x68] sm:$0xff] }
  0x2a   : > { %751 = vmatprep.mubr.bf16.mxu1 %v1476_v39  ;;  %1376 = vmatpush3.bf16.msra.mxu1 %v1375_v48 }
  0x2b   : > { %1377 = vmatprep.subr.bf16.mxu1 %v1494_v49 }
  0x2c   : > { %1295 = vmatpush3.bf16.msra.mxu0 %v1473_v37  ;;  %v1001_v37 = vld [vmem:[%s1817_s6 + $0x60] sm:$0xff] }
  0x2d   : > { %1296 = vmatprep.subr.bf16.mxu0 %v1480_v41 }
  0x2e   : > { %1379 = vmatpush3.bf16.msra.mxu1 %v1378_v52 }
  0x2f   : > { %703 = vmatmul.mubr.bf16.gmra.mrb[4].mxu0 %v1478_v40  ;;  %1380 = vmatprep.subr.bf16.mxu1 %v1494_v49 }
  0x30   : > { %752 = vmatmul.mubr.bf16.gmra.mrb[4].mxu1 %v1479_v42  ;;  %1300 = vmatprep.mubr.msk.bf16.mxu0 %vm655_vm0, %v1482_v43  ;;  %v1417_v42 = vpack.c.bf16 %v1002_v38, %v1001_v37  ;;  %v1191_v37 = vld [vmem:[%s1814_s3] ss:$0 sm:$0xff] }
  0x31   : > { %1297 = vmatpush3.bf16.msra.mxu0 %v1480_v41  ;;  %1336 = vmatprep.mubr.msk.f32.mxu1 %vm1495_vm1, %v1496_v3 }
  0x32   : > { %1298 = vmatprep.subr.bf16.mxu0 %v1481_v44  ;;  %1382 = vmatpush3.bf16.msra.mxu1 %v1381_v55 }
  0x33   : > { %1383 = vmatprep.subr.bf16.mxu1 %v1494_v49 }
  0x35   : > { %1299 = vmatpush3.bf16.msra.mxu0 %v1481_v44 }
  0x36   : > { %1398 = vmatprep.subr.bf16.mxu0 %v1494_v49  ;;  %1385 = vmatpush3.bf16.msra.mxu1 %v1384_v58 }
  0x37   : > { %1386 = vmatprep.subr.bf16.mxu1 %v1494_v49 }
  0x38   : > { %1301 = vmatmul.mubr.msk.bf16.vlgmr.msra.gmra.mrb[8].mxu0 %vm655_vm0, %v1483_v45 }
  0x39   : > { %1371 = vmatprep.mubr.msk.f32.mxu0 %vm1495_vm1, %v1496_v3  ;;  %1400 = vmatpush3.bf16.msra.mxu0 %v1399_v11 }
  0x3a   : > { %1388 = vmatpush3.bf16.msra.mxu1 %v1387_v61  ;;  %1401 = vmatprep.subr.bf16.mxu0 %v1494_v49 }
  0x3b   : > { %1389 = vmatprep.subr.bf16.mxu1 %v1494_v49 }
  0x3d   : > { %1403 = vmatpush3.bf16.msra.mxu0 %v1402_v13 }
  0x3e   : > { %1391 = vmatpush3.bf16.msra.mxu1 %v1390_v0  ;;  %1404 = vmatprep.subr.bf16.mxu0 %v1494_v49 }
  0x3f   : > { %1392 = vmatprep.subr.bf16.mxu1 %v1494_v49 }
  0x41   : > { %1406 = vmatpush3.bf16.msra.mxu0 %v1405_v16 }
  0x42   : > { %1394 = vmatpush3.bf16.msra.mxu1 %v1393_v4  ;;  %1407 = vmatprep.subr.bf16.mxu0 %v1494_v49 }
  0x43   : > { %1395 = vmatprep.subr.bf16.mxu1 %v1494_v49 }
  0x45   : > { %1409 = vmatpush3.bf16.msra.mxu0 %v1408_v19 }
  0x46   : > { %1397 = vmatpush3.bf16.msra.mxu1 %v1396_v7  ;;  %1410 = vmatprep.subr.bf16.mxu0 %v1494_v49 }
  0x49   : > { %1412 = vmatpush3.bf16.msra.mxu0 %v1411_v22 }
  0x4a   : > { %1413 = vmatprep.subr.bf16.mxu0 %v1494_v49 }
  0x4d   : > { %1415 = vmatpush3.bf16.msra.mxu0 %v1414_v34 }
  0x4e   : > { %1416 = vmatprep.subr.bf16.mxu0 %v1494_v49 }
  0x51   : > { %1418 = vmatpush3.bf16.msra.mxu0 %v1417_v42 }
  0x52   : > { %1419 = vmatprep.subr.bf16.mxu0 %v1494_v49 }
  0xfa   : > { %v1212_v23 = vpop.f32.mrb[0].mxu0 }
  0xfb   : > { %v1240_v26 = vpop.f32.mrb[0].mxu1  ;;  %v1213_v27 = vpop.f32.mrb[1].mxu0 }
  0xfc   : > { %v1214_v28 = vadd.f32 %v1213_v27, %v1212_v23  ;;  %v1241_v29 = vpop.f32.mrb[1].mxu1  ;;  %v1215_v30 = vpop.f32.mrb[2].mxu0 }
  0xfd   : > { %v1242_v31 = vadd.f32 %v1241_v29, %v1240_v26  ;;  %v1243_v32 = vpop.f32.mrb[2].mxu1  ;;  %v1216_v33 = vpop.f32.mrb[3].mxu0 }
  0xfe   : > { %v1217_v35 = vadd.f32 %v1216_v33, %v1215_v30  ;;  %v1244_v36 = vpop.f32.mrb[3].mxu1  ;;  %v842_v30 = vlaneseq }
  0xff   : > { %v1245_v39 = vadd.f32 %v1244_v36, %v1243_v32  ;;  %v746_v40 = vadd.f32 %v1242_v31, %v1214_v28  ;;  %v837_v32 = vld [vmem:[%s1813_s2] sm:$0x1] }
 0x100   : > { %v843_v31 = vshrl.u32 %v842_v30, 7 }
 0x101   : > { %v749_v41 = vadd.f32 %v1245_v39, %v1217_v35 }
 0x102   : > { %v1218_v43 = vpop.f32.mrb[4].mxu0  ;;  %v844_v33 = vsub.s32 0, %v843_v31 }
 0x103   : > { %v1246_v44 = vpop.f32.mrb[4].mxu1  ;;  %v1219_v45 = vpop.f32.mrb[5].mxu0 }
 0x104   : > { %v1220_v46 = vadd.f32 %v1219_v45, %v1218_v43  ;;  %v1247_v47 = vpop.f32.mrb[5].mxu1  ;;  %v1221_v48 = vpop.f32.mrb[6].mxu0 }
 0x105   : > { %v1248_v50 = vadd.f32 %v1247_v47, %v1246_v44  ;;  %v1249_v51 = vpop.f32.mrb[6].mxu1  ;;  %v1222_v52 = vpop.f32.mrb[7].mxu0 }
 0x106   : > { %v1223_v53 = vadd.f32 %v1222_v52, %v1221_v48  ;;  %v1250_v54 = vpop.f32.mrb[7].mxu1 }
 0x107   : > { %v1251_v55 = vadd.f32 %v1250_v54, %v1249_v51  ;;  %v754_v56 = vadd.f32 %v1248_v50, %v1220_v46 }
 0x109   : > { %v757_v57 = vadd.f32 %v1251_v55, %v1223_v53 }
 0x10b   : > { %v1302_v58 = vpop.f32.mrb[8].mxu0 }
 0x10c   : > { %v803_v59 = vadd.f32 %v1302_v58, %v754_v56  ;;  %v794_v60 = vpop.f32.mrb[9].mxu0 }
 0x10d   : > { %v795_v61 = vadd.f32 %v794_v60, %v746_v40  ;;  %v1303_v62 = vpop.f32.mrb[10].mxu0 }
 0x10e   : > { %v806_v63 = vadd.f32 %v1303_v62, %v757_v57  ;;  %v797_v0 = vpop.f32.mrb[11].mxu0 }
 0x10f   : > { %v798_v1 = vadd.f32 %v797_v0, %v749_v41 }
 0x111   : > { %v809_v2 = vadd.f32 %v798_v1, %v795_v61 }
 0x113   : > { %v810_v3 = vadd.f32 %v809_v2, %v803_v59 }
 0x115   : > { %v811_v4 = vadd.f32 %v810_v3, %v806_v63 }
 0x117   : > { %v812_v5 = vrot.slane %v811_v4, 4 }
 0x119   : > { %v813_v6 = vadd.f32 %v812_v5, %v811_v4 }
 0x11b   : > { %v814_v7 = vrot.slane %v813_v6, 2 }
 0x11d   : > { %v815_v8 = vadd.f32 %v814_v7, %v813_v6 }
 0x11f   : > { %v816_v9 = vrot.slane %v815_v8, 1 }
 0x121   : > { %v817_v49 = vadd.f32 %v816_v9, %v815_v8  ;;  %v1003_v8 = vld [vmem:[%s1817_s6 + $0x70] sm:$0xff]  ;;  %v1004_v9 = vld [vmem:[%s1817_s6 + $0x78] sm:$0xff] }
 0x123   : > { %v818_v10 = vmul.f32 0.03125, %v817_v49  ;;  %v1420_v49 = vpack.c.bf16 %v1004_v9, %v1003_v8 }
 0x125   : > { %v819_v11 = vsub.f32 %v795_v61, %v818_v10  ;;  %v820_v12 = vsub.f32 %v798_v1, %v818_v10  ;;  %v821_v13 = vsub.f32 %v803_v59, %v818_v10  ;;  %v822_v14 = vsub.f32 %v806_v63, %v818_v10  ;;  %1421 = vmatpush3.bf16.msra.mxu0 %v1420_v49  ;;  %v1192_v10 = vld [vmem:[%s1816_s5] ss:$0 sm:$0xff] }
 0x127   : > { %v823_v15 = vmul.f32 %v819_v11, %v819_v11  ;;  %v824_v16 = vmul.f32 %v820_v12, %v820_v12  ;;  %v825_v17 = vmul.f32 %v821_v13, %v821_v13  ;;  %v826_v19 = vmul.f32 %v822_v14, %v822_v14 }
 0x129   : > { %v827_v18 = vadd.f32 %v824_v16, %v823_v15  ;;  %v1193_v15 = vld [vmem:[%s1818_s7] ss:$0 sm:$0xff] }
 0x12b   : > { %v828_v20 = vadd.f32 %v827_v18, %v825_v17 }
 0x12d   : > { %v829_v21 = vadd.f32 %v828_v20, %v826_v19 }
 0x12f   : > { %v830_v22 = vrot.slane %v829_v21, 4 }
 0x131   : > { %v831_v23 = vadd.f32 %v830_v22, %v829_v21 }
 0x133   : > { %v832_v24 = vrot.slane %v831_v23, 2 }
 0x135   : > { %v833_v25 = vadd.f32 %v832_v24, %v831_v23 }
 0x137   : > { %v834_v26 = vrot.slane %v833_v25, 1 }
 0x139   : > { %v835_v27 = vadd.f32 %v834_v26, %v833_v25 }
 0x13b   : > { %v836_v28 = vmul.f32 0.03125, %v835_v27 }
 0x13d   : > { %v838_v29 = vadd.f32 1e-05, %v836_v28 }
 0x13f   : > { %1484 = vrsqrt.f32 %v838_v29 }
 0x149   : > { %v1485_v34 = vpop.eup %1484 }
 0x14a   : > { %v840_v35 = vmul.f32 %v1485_v34, %v837_v32 }
 0x14c   : > { %v845_v36 = vrot.slane %v840_v35, %v844_v33 }
 0x14e   : > { %v847_v38 = vmul.f32 %v845_v36, %v819_v11  ;;  %v848_v39 = vmul.f32 %v845_v36, %v820_v12  ;;  %v849_v40 = vmul.f32 %v845_v36, %v821_v13  ;;  %v850_v41 = vmul.f32 %v845_v36, %v822_v14 }
 0x150   : > { %v858_v42 = vadd.f32 %v1191_v37, %v847_v38  ;;  %v859_v43 = vadd.f32 %v1191_v37, %v848_v39  ;;  %v860_v44 = vadd.f32 %v1191_v37, %v849_v40  ;;  %v861_v45 = vadd.f32 %v1191_v37, %v850_v41 }
 0x152   : > { %v862_v46 = vmax.f32 %v858_v42, 0.0  ;;  %v863_v47 = vmax.f32 %v859_v43, 0.0  ;;  %v864_v48 = vmax.f32 %v860_v44, 0.0  ;;  %v865_v50 = vmax.f32 %v861_v45, 0.0 }
 0x154   : > { %v866_v51 = vmax.f32 %v862_v46, %v863_v47  ;;  %v867_v52 = vmax.f32 %v864_v48, %v865_v50 }
 0x156   : > { %v868_v53 = vmax.f32 %v866_v51, %v867_v52 }
 0x158   : > { %v870_v54 = vcombine.high %v868_v53, %v868_v53  ;;  %v873_v55 = vsel %vm872_vm2, %v868_v53, 0.0 }
 0x159   : > { %v874_v56 = vrot.slane %v873_v55, 4 }
 0x15a   : > { %v880_v57 = vsel %vm872_vm2, %v870_v54, 0.0 }
 0x15b   : > { %v875_v58 = vadd.f32 %v874_v56, %v873_v55  ;;  %v881_v59 = vrot.slane %v880_v57, 4 }
 0x15d   : > { %v876_v60 = vrot.slane %v875_v58, 2  ;;  %v882_v61 = vadd.f32 %v881_v59, %v880_v57 }
 0x15f   : > { %v877_v62 = vadd.f32 %v876_v60, %v875_v58  ;;  %v883_v63 = vrot.slane %v882_v61, 2 }
 0x161   : > { %v878_v0 = vrot.slane %v877_v62, 1  ;;  %v884_v1 = vadd.f32 %v883_v63, %v882_v61 }
 0x163   : > { %v879_v2 = vadd.f32 %v878_v0, %v877_v62  ;;  %v885_v3 = vrot.slane %v884_v1, 1 }
 0x165   : > { %v886_v4 = vadd.f32 %v885_v3, %v884_v1  ;;  %v888_v5 = vmul.f32 0.25, %v879_v2 }
 0x167   : > { %v889_v6 = vmul.f32 0.25, %v886_v4 }
 0x169   : > { %v916_v7 = vsel %vm915_vm3, %v889_v6, %v888_v5 }
 0x16a   : > { %1337 = vmatmul.mubr.f32.vlgmr.msra.gmra.mrb[8].mxu1 %v916_v7 }
 0x23d   : > { %v984_v11 = vpop.f32.mrb[8].mxu1 }
 0x23e   : > { %v985_v12 = vadd.f32 %v1192_v10, %v984_v11  ;;  %v1338_v13 = vpop.f32.mrb[9].mxu1 }
 0x240   : > { %v988_v14 = vmax.f32 %v985_v12, 0.0 }
 0x242   : > { %1372 = vmatmul.mubr.f32.vlgmr.msra.gmra.mrb[12].mxu0 %v988_v14 }
 0x315   : > { %v1078_v16 = vpop.f32.mrb[12].mxu0 }
 0x316   : > { %v1079_v17 = vadd.f32 %v1193_v15, %v1078_v16  ;;  %v1373_v18 = vpop.f32.mrb[13].mxu0 }
 0x318   : > { %1082 = vst [vmem:[%s303_s18] sm:$0x3] %v1079_v17 }
 0x319 PF: > { %s18_s27 = sadd.s32 1, %s1492_s27  }
 0x31a   : > { %p15_p4 = scmp.ge.s32.totalorder %s18_s27, 4  }
 0x31c   :  { %17 = sbr.rel (!%p15_p4) target bundleno = 1 (0x1), region = 82 }

</bundles_post_ra>
